<compile_context>
chip_gen: v7x
topology: tpu7x:2x2x1
jax: 0.10.0
libtpu: 0.0.40
codegen_flags: <defaults>
</compile_context>

<pallas_src>
import functools

import jax
import jax.numpy as jnp
from jax.experimental import pallas as pl
from jax.experimental.pallas import tpu as pltpu


# -----------------------------------------------------------------------------
# helpers
# -----------------------------------------------------------------------------
def _pick_tile(dim, candidates):
    """Largest candidate that evenly divides dim, else the full dim."""
    for c in candidates:
        if c <= dim and dim % c == 0:
            return c
    return dim


def _gelu_exact(x):
    # matches torch.nn.functional.gelu (erf formulation, the PyTorch default)
    return 0.5 * x * (1.0 + jax.lax.erf(x * 0.7071067811865476))


# -----------------------------------------------------------------------------
# Pallas kernels
# -----------------------------------------------------------------------------
def matmul_kernel(x_ref, w_ref, b_ref, o_ref, acc_ref, *, act):
    """Tiled y = act(x @ w + b); K-accumulation in f32 scratch, bf16 MXU feeds."""
    @pl.when(pl.program_id(2) == 0)
    def _():
        acc_ref[...] = jnp.zeros_like(acc_ref)

    acc_ref[...] += jnp.dot(x_ref[...].astype(jnp.bfloat16), w_ref[...],
                            preferred_element_type=jnp.float32)

    @pl.when(pl.program_id(2) == pl.num_programs(2) - 1)
    def _():
        y = acc_ref[...] + b_ref[...]
        if act == "gelu":
            y = _gelu_exact(y)
        o_ref[...] = y.astype(o_ref.dtype)


def linear_pallas(x2d, w_bf16, b, act=None):
    """y = act(x2d @ w + b).  x2d f32 (M, K); w bf16 (K, Nout); b f32 (Nout,)."""
    M, K = x2d.shape
    Nout = w_bf16.shape[1]
    tm = _pick_tile(M, (512, 256, 128, 64, 32, 16, 8))
    tn = _pick_tile(Nout, (512, 256, 128))
    tk = _pick_tile(K, (512, 256, 128))
    grid = (M // tm, Nout // tn, K // tk)
    return pl.pallas_call(
        functools.partial(matmul_kernel, act=act),
        out_shape=jax.ShapeDtypeStruct((M, Nout), x2d.dtype),
        grid=grid,
        in_specs=[pl.BlockSpec((tm, tk), lambda i, j, k: (i, k)),
                  pl.BlockSpec((tk, tn), lambda i, j, k: (k, j)),
                  pl.BlockSpec((1, tn), lambda i, j, k: (0, j))],
        out_specs=pl.BlockSpec((tm, tn), lambda i, j, k: (i, j)),
        scratch_shapes=[pltpu.VMEM((tm, tn), jnp.float32)],
        compiler_params=pltpu.CompilerParams(
            dimension_semantics=("parallel", "parallel", "arbitrary")),
        cost_estimate=pl.CostEstimate(
            flops=2 * M * K * Nout,
            transcendentals=(M * Nout if act == "gelu" else 0),
            bytes_accessed=M * K * 4 + K * Nout * 2 + M * Nout * 4 + Nout * 4),
    )(x2d, w_bf16, b.reshape(1, Nout))


def linear_add_ln_kernel(x_ref, w_ref, b_ref, res_ref, g_ref, beta_ref,
                         o_ref, acc_ref, *, eps):
    """Tiled (over M, K) y = LayerNorm(res + x @ w + b); LN over full output width."""
    @pl.when(pl.program_id(1) == 0)
    def _():
        acc_ref[...] = jnp.zeros_like(acc_ref)

    acc_ref[...] += jnp.dot(x_ref[...].astype(jnp.bfloat16), w_ref[...],
                            preferred_element_type=jnp.float32)

    @pl.when(pl.program_id(1) == pl.num_programs(1) - 1)
    def _():
        z = res_ref[...] + acc_ref[...] + b_ref[...]
        mean = jnp.mean(z, axis=-1, keepdims=True)
        var = jnp.mean((z - mean) ** 2, axis=-1, keepdims=True)  # biased (PyTorch LN)
        zn = (z - mean) * jax.lax.rsqrt(var + eps)
        o_ref[...] = (zn * g_ref[...] + beta_ref[...]).astype(o_ref.dtype)


def linear_add_ln_pallas(x2d, w_bf16, b, resid2d, ln_w, ln_b, eps=1e-5):
    """LayerNorm(resid + x2d @ w + b) fused in the matmul epilogue."""
    M, K = x2d.shape
    D = w_bf16.shape[1]
    tm = _pick_tile(M, (512, 256, 128, 64, 32, 16, 8))
    tk = _pick_tile(K, (512, 256, 128))
    grid = (M // tm, K // tk)
    return pl.pallas_call(
        functools.partial(linear_add_ln_kernel, eps=eps),
        out_shape=jax.ShapeDtypeStruct((M, D), x2d.dtype),
        grid=grid,
        in_specs=[pl.BlockSpec((tm, tk), lambda i, k: (i, k)),
                  pl.BlockSpec((tk, D), lambda i, k: (k, 0)),
                  pl.BlockSpec((1, D), lambda i, k: (0, 0)),
                  pl.BlockSpec((tm, D), lambda i, k: (i, 0)),
                  pl.BlockSpec((1, D), lambda i, k: (0, 0)),
                  pl.BlockSpec((1, D), lambda i, k: (0, 0))],
        out_specs=pl.BlockSpec((tm, D), lambda i, k: (i, 0)),
        scratch_shapes=[pltpu.VMEM((tm, D), jnp.float32)],
        compiler_params=pltpu.CompilerParams(
            dimension_semantics=("parallel", "arbitrary")),
        cost_estimate=pl.CostEstimate(
            flops=2 * M * K * D + 8 * M * D,
            transcendentals=M,
            bytes_accessed=M * K * 4 + K * D * 2 + 2 * M * D * 4),
    )(x2d, w_bf16, b.reshape(1, D), resid2d, ln_w.reshape(1, D), ln_b.reshape(1, D))


def ln_kernel(x_ref, g_ref, b_ref, o_ref, *, eps):
    z = x_ref[...]
    mean = jnp.mean(z, axis=-1, keepdims=True)
    var = jnp.mean((z - mean) ** 2, axis=-1, keepdims=True)  # biased (PyTorch LN)
    zn = (z - mean) * jax.lax.rsqrt(var + eps)
    o_ref[...] = (zn * g_ref[...] + b_ref[...]).astype(o_ref.dtype)


def layernorm_pallas(x2d, w, b, eps=1e-5):
    """Row-tiled LayerNorm over the last dim (used for the embedding LN)."""
    M, D = x2d.shape
    tm = _pick_tile(M, (1024, 512, 256, 128, 64, 32, 16, 8))
    return pl.pallas_call(
        functools.partial(ln_kernel, eps=eps),
        out_shape=jax.ShapeDtypeStruct((M, D), x2d.dtype),
        grid=(M // tm,),
        in_specs=[pl.BlockSpec((tm, D), lambda i: (i, 0)),
                  pl.BlockSpec((1, D), lambda i: (0, 0)),
                  pl.BlockSpec((1, D), lambda i: (0, 0))],
        out_specs=pl.BlockSpec((tm, D), lambda i: (i, 0)),
        compiler_params=pltpu.CompilerParams(dimension_semantics=("parallel",)),
    )(x2d, w.reshape(1, D), b.reshape(1, D))


def attn_kernel(qkv_ref, o_ref, *, nhead):
    """One batch element, all heads.  Output block is lane-dense (width D)."""
    x = qkv_ref[0]                        # (S, 3D) f32
    S = x.shape[0]
    D = x.shape[1] // 3
    hd = D // nhead
    for h in range(nhead):                # static unroll over heads
        q = x[:, h * hd:(h + 1) * hd].astype(jnp.bfloat16)
        k = x[:, D + h * hd:D + (h + 1) * hd].astype(jnp.bfloat16)
        v = x[:, 2 * D + h * hd:2 * D + (h + 1) * hd].astype(jnp.bfloat16)
        # NOTE: reference ScaledDotProduct applies NO 1/sqrt(head_dim) scaling.
        s = jax.lax.dot_general(q, k, (((1,), (1,)), ((), ())),
                                preferred_element_type=jnp.float32)   # (S, S)
        s = s - jnp.max(s, axis=-1, keepdims=True)
        p = jnp.exp(s)
        p = p * pl.reciprocal(jnp.sum(p, axis=-1, keepdims=True), approx=True)
        out_h = jnp.dot(p.astype(jnp.bfloat16), v,
                        preferred_element_type=jnp.float32)           # (S, hd)
        o_ref[0, :, h * hd:(h + 1) * hd] = out_h.astype(o_ref.dtype)


def attention_pallas(qkv, nhead):
    """qkv: (N, S, 3D) fused projections -> (N, S, D) attention output."""
    N, S, threeD = qkv.shape
    D = threeD // 3
    # TODO(synk): for long sequences switch to an online-softmax (flash) formulation
    # tiled over keys; here the per-batch nhead*S*S score tensor fits VMEM.
    return pl.pallas_call(
        functools.partial(attn_kernel, nhead=nhead),
        out_shape=jax.ShapeDtypeStruct((N, S, D), qkv.dtype),
        grid=(N,),
        in_specs=[pl.BlockSpec((1, S, threeD), lambda n: (n, 0, 0))],
        out_specs=pl.BlockSpec((1, S, D), lambda n: (n, 0, 0)),
        compiler_params=pltpu.CompilerParams(dimension_semantics=("parallel",)),
    )(qkv)


# -----------------------------------------------------------------------------
# Parameter initialization (deterministic, synthetic)
# -----------------------------------------------------------------------------
def _normal(key, shape, std=0.02):
    return std * jax.random.normal(key, shape, dtype=jnp.float32)


def init_params(key, ntoken, ninp, nhead, nhid, nlayers, max_len=512):
    keys = iter(jax.random.split(key, 8 + 10 * nlayers))
    p = {
        "nhead": nhead,
        # embedding tables
        "embed": _normal(next(keys), (ntoken, ninp)),
        "pos_embed": _normal(next(keys), (max_len, ninp)),
        "tok_type_embed": _normal(next(keys), (2, ninp)),
        "emb_ln_w": jnp.ones((ninp,), jnp.float32),
        "emb_ln_b": jnp.zeros((ninp,), jnp.float32),
        "layers": [],
    }
    for _ in range(nlayers):
        lp = {
            # fused Q/K/V projection; matmul weights stored bf16 for the MXU
            "wqkv": _normal(next(keys), (ninp, 3 * ninp)).astype(jnp.bfloat16),
            "bqkv": _normal(next(keys), (3 * ninp,)),
            "wo": _normal(next(keys), (ninp, ninp)).astype(jnp.bfloat16),
            "bo": _normal(next(keys), (ninp,)),
            "w1": _normal(next(keys), (ninp, nhid)).astype(jnp.bfloat16),
            "b1": _normal(next(keys), (nhid,)),
            "w2": _normal(next(keys), (nhid, ninp)).astype(jnp.bfloat16),
            "b2": _normal(next(keys), (ninp,)),
            "ln1_w": jnp.ones((ninp,), jnp.float32),
            "ln1_b": jnp.zeros((ninp,), jnp.float32),
            "ln2_w": jnp.ones((ninp,), jnp.float32),
            "ln2_b": jnp.zeros((ninp,), jnp.float32),
        }
        p["layers"].append(lp)
    return p


# -----------------------------------------------------------------------------
# Model forward (glue in plain JAX, hot paths in Pallas)
# -----------------------------------------------------------------------------
def encoder_layer_forward(x2, lp, N, S, nhead, eps=1e-5):
    """x2: (N*S, D) batch-major flattened activations."""
    D = x2.shape[1]
    qkv = linear_pallas(x2, lp["wqkv"], lp["bqkv"])                   # (N*S, 3D)
    attn = attention_pallas(qkv.reshape(N, S, 3 * D), nhead)          # (N, S, D)
    # norm1(src + Wo @ attn)  -- residual add + LN fused into the matmul epilogue
    x2 = linear_add_ln_pallas(attn.reshape(N * S, D), lp["wo"], lp["bo"],
                              x2, lp["ln1_w"], lp["ln1_b"], eps)
    h = linear_pallas(x2, lp["w1"], lp["b1"], act="gelu")             # (N*S, nhid)
    # norm2(src + W2 @ gelu(W1 @ src))
    x2 = linear_add_ln_pallas(h, lp["w2"], lp["b2"],
                              x2, lp["ln2_w"], lp["ln2_b"], eps)
    return x2


def bert_model_forward(params, src_tokens, token_type_input=None):
    """src_tokens: (S, N) int32 token ids. Returns (S, N, ninp) encoder output."""
    S, N = src_tokens.shape
    D = params["embed"].shape[1]

    # BertEmbedding: token + positional + token-type embeddings, then LayerNorm.
    # (embedding gathers are XLA glue; the LN reduction runs in Pallas, row-tiled)
    src_nm = src_tokens.T                                              # (N, S) batch-major
    tok = params["embed"][src_nm]                                      # (N, S, D)
    pos = jnp.broadcast_to(params["pos_embed"][jnp.arange(S)][None, :, :], (N, S, D))
    if token_type_input is None:
        tt_ids = jnp.zeros((N, S), dtype=jnp.int32)
    else:
        tt_ids = token_type_input.T                                    # reference passes (S, N)
    tt = params["tok_type_embed"][tt_ids]                              # (N, S, D)

    emb = (tok + pos + tt).reshape(N * S, D)
    x2 = layernorm_pallas(emb, params["emb_ln_w"], params["emb_ln_b"], eps=1e-5)
    # dropout = identity (eval)

    for lp in params["layers"]:
        x2 = encoder_layer_forward(x2, lp, N, S, params["nhead"])

    # TransformerEncoder(norm=None): no final norm.  Return in the reference
    # seq-major (S, N, D) layout -- one transpose for the whole model.
    return x2.reshape(N, S, D).transpose(1, 0, 2)


# -----------------------------------------------------------------------------
if __name__ == "__main__":
    ntoken, ninp, nhead, nhid, nlayers = 100, 32, 2, 64, 2
    S, N = 8, 2  # sequence, batch  (BertModel takes (S, N) token ids)

    key = jax.random.PRNGKey(0)
    pkey, dkey = jax.random.split(key)
    params = init_params(pkey, ntoken, ninp, nhead, nhid, nlayers)

    src_tokens = jax.random.randint(dkey, (S, N), 0, ntoken, dtype=jnp.int32)

    fwd = jax.jit(functools.partial(bert_model_forward, params))
    out = fwd(src_tokens)
    out = jax.block_until_ready(out)
    assert out.shape == (S, N, ninp), out.shape
    print("KERNEL_OK")
</pallas_src>

<mosaic_0001>
module attributes {stable_mosaic.version = 11 : i64} {
  func.func @matmul_kernel(%arg0: i32, %arg1: i32, %arg2: i32, %arg3: memref<16x32xf32, #tpu.memory_space<vmem>>, %arg4: memref<32x96xbf16, #tpu.memory_space<vmem>>, %arg5: memref<1x96xf32, #tpu.memory_space<vmem>>, %arg6: memref<16x96xf32, #tpu.memory_space<vmem>>, %arg7: memref<16x96xf32, #tpu.memory_space<vmem>>) attributes {dimension_semantics = [#tpu.dimension_semantics<parallel>, #tpu.dimension_semantics<parallel>, #tpu.dimension_semantics<arbitrary>], iteration_bounds = array<i64: 1, 1, 1>, scalar_prefetch = 0 : i64, scratch_operands = 1 : i64, tpu.core_type = #tpu.core_type<tc>, window_params = [{transform_indices = @transform_0, window_bounds = array<i64: 16, 32>}, {transform_indices = @transform_1, window_bounds = array<i64: 32, 96>}, {transform_indices = @transform_2, window_bounds = array<i64: 1, 96>}, {transform_indices = @transform_3, window_bounds = array<i64: 16, 96>}]} {
    %c0_i32 = arith.constant 0 : i32
    %0 = arith.cmpi eq, %arg2, %c0_i32 : i32
    %1 = arith.extui %0 : i1 to i32
    %c0_i32_0 = arith.constant 0 : i32
    %2 = arith.cmpi ne, %1, %c0_i32_0 : i32
    scf.if %2 {
      %cst_10 = arith.constant 0.000000e+00 : f32
      %13 = vector.broadcast %cst_10 : f32 to vector<16x96xf32>
      %c0_11 = arith.constant 0 : index
      %c0_12 = arith.constant 0 : index
      %14 = vector.load %arg7[%c0_11, %c0_12] : memref<16x96xf32, #tpu.memory_space<vmem>>, vector<16x96xf32>
      tpu.vector_store %arg7[%c0_11, %c0_12], %13 {strides = array<i32>} : memref<16x96xf32, #tpu.memory_space<vmem>>, vector<16x96xf32>,
    } else {
    }
    %c0 = arith.constant 0 : index
    %c0_1 = arith.constant 0 : index
    %3 = vector.load %arg7[%c0, %c0_1] : memref<16x96xf32, #tpu.memory_space<vmem>>, vector<16x96xf32>
    %c0_2 = arith.constant 0 : index
    %c0_3 = arith.constant 0 : index
    %4 = vector.load %arg3[%c0_2, %c0_3] : memref<16x32xf32, #tpu.memory_space<vmem>>, vector<16x32xf32>
    %5 = arith.truncf %4 : vector<16x32xf32> to vector<16x32xbf16>
    %c0_4 = arith.constant 0 : index
    %c0_5 = arith.constant 0 : index
    %6 = vector.load %arg4[%c0_4, %c0_5] : memref<32x96xbf16, #tpu.memory_space<vmem>>, vector<32x96xbf16>
    %cst = arith.constant dense<0.000000e+00> : vector<16x96xf32>
    %7 = tpu.matmul %5, %6, %cst {dimension_numbers = #tpu.dot_dimension_numbers<[1], [0], [0], [1], [0, 0, 1, 1], [], []>} : vector<16x32xbf16>, vector<32x96xbf16>, vector<16x96xf32> -> vector<16x96xf32>
    %8 = arith.addf %3, %7 : vector<16x96xf32>
    %c0_6 = arith.constant 0 : index
    %c0_7 = arith.constant 0 : index
    %9 = vector.load %arg7[%c0_6, %c0_7] : memref<16x96xf32, #tpu.memory_space<vmem>>, vector<16x96xf32>
    tpu.vector_store %arg7[%c0_6, %c0_7], %8 {strides = array<i32>} : memref<16x96xf32, #tpu.memory_space<vmem>>, vector<16x96xf32>,
    %c0_i32_8 = arith.constant 0 : i32
    %10 = arith.cmpi eq, %arg2, %c0_i32_8 : i32
    %11 = arith.extui %10 : i1 to i32
    %c0_i32_9 = arith.constant 0 : i32
    %12 = arith.cmpi ne, %11, %c0_i32_9 : i32
    scf.if %12 {
      %c0_10 = arith.constant 0 : index
      %c0_11 = arith.constant 0 : index
      %13 = vector.load %arg7[%c0_10, %c0_11] : memref<16x96xf32, #tpu.memory_space<vmem>>, vector<16x96xf32>
      %c0_12 = arith.constant 0 : index
      %c0_13 = arith.constant 0 : index
      %14 = vector.load %arg5[%c0_12, %c0_13] : memref<1x96xf32, #tpu.memory_space<vmem>>, vector<1x96xf32>
      %15 = vector.broadcast %14 : vector<1x96xf32> to vector<16x96xf32>
      %16 = arith.addf %13, %15 : vector<16x96xf32>
      %c0_14 = arith.constant 0 : index
      %c0_15 = arith.constant 0 : index
      %17 = vector.load %arg6[%c0_14, %c0_15] : memref<16x96xf32, #tpu.memory_space<vmem>>, vector<16x96xf32>
      tpu.vector_store %arg6[%c0_14, %c0_15], %16 {strides = array<i32>} : memref<16x96xf32, #tpu.memory_space<vmem>>, vector<16x96xf32>,
    } else {
    }
    return
  }
  func.func @transform_0(%arg0: i32, %arg1: i32, %arg2: i32) -> (i32, i32) {
    %c0_i32 = arith.constant 0 : i32
    return %arg0, %arg2 : i32, i32
  }
  func.func @transform_1(%arg0: i32, %arg1: i32, %arg2: i32) -> (i32, i32) {
    %c0_i32 = arith.constant 0 : i32
    return %arg2, %arg1 : i32, i32
  }
  func.func @transform_2(%arg0: i32, %arg1: i32, %arg2: i32) -> (i32, i32) {
    %c0_i32 = arith.constant 0 : i32
    %c0_i32_0 = arith.constant 0 : i32
    return %c0_i32, %arg1 : i32, i32
  }
  func.func @transform_3(%arg0: i32, %arg1: i32, %arg2: i32) -> (i32, i32) {
    %c0_i32 = arith.constant 0 : i32
    return %arg0, %arg1 : i32, i32
  }
}

module attributes {stable_mosaic.version = 11 : i64} {
  func.func @ln_kernel(%arg0: i32, %arg1: memref<16x32xf32, #tpu.memory_space<vmem>>, %arg2: memref<1x32xf32, #tpu.memory_space<vmem>>, %arg3: memref<1x32xf32, #tpu.memory_space<vmem>>, %arg4: memref<16x32xf32, #tpu.memory_space<vmem>>) attributes {dimension_semantics = [#tpu.dimension_semantics<parallel>], iteration_bounds = array<i64: 1>, scalar_prefetch = 0 : i64, scratch_operands = 0 : i64, tpu.core_type = #tpu.core_type<tc>, window_params = [{transform_indices = @transform_0, window_bounds = array<i64: 16, 32>}, {pipeline_mode = #tpu.pipeline_mode<synchronous>, transform_indices = @transform_1, window_bounds = array<i64: 1, 32>}, {pipeline_mode = #tpu.pipeline_mode<synchronous>, transform_indices = @transform_2, window_bounds = array<i64: 1, 32>}, {transform_indices = @transform_3, window_bounds = array<i64: 16, 32>}]} {
    %c0 = arith.constant 0 : index
    %c0_0 = arith.constant 0 : index
    %0 = vector.load %arg1[%c0, %c0_0] : memref<16x32xf32, #tpu.memory_space<vmem>>, vector<16x32xf32>
    %cst = arith.constant dense<0.000000e+00> : vector<16xf32>
    %1 = vector.multi_reduction <add>, %0, %cst [1] : vector<16x32xf32> to vector<16xf32>
    %2 = vector.shape_cast %1 : vector<16xf32> to vector<16x1xf32>
    %cst_1 = arith.constant 3.200000e+01 : f32
    %3 = vector.broadcast %cst_1 : f32 to vector<16x1xf32>
    %4 = arith.divf %2, %3 : vector<16x1xf32>
    %5 = vector.broadcast %4 : vector<16x1xf32> to vector<16x32xf32>
    %6 = arith.subf %0, %5 : vector<16x32xf32>
    %7 = arith.mulf %6, %6 : vector<16x32xf32>
    %cst_2 = arith.constant dense<0.000000e+00> : vector<16xf32>
    %8 = vector.multi_reduction <add>, %7, %cst_2 [1] : vector<16x32xf32> to vector<16xf32>
    %9 = vector.shape_cast %8 : vector<16xf32> to vector<16x1xf32>
    %cst_3 = arith.constant 3.200000e+01 : f32
    %10 = vector.broadcast %cst_3 : f32 to vector<16x1xf32>
    %11 = arith.divf %9, %10 : vector<16x1xf32>
    %12 = vector.broadcast %4 : vector<16x1xf32> to vector<16x32xf32>
    %13 = arith.subf %0, %12 : vector<16x32xf32>
    %cst_4 = arith.constant 9.99999974E-6 : f32
    %14 = vector.broadcast %cst_4 : f32 to vector<16x1xf32>
    %15 = arith.addf %11, %14 : vector<16x1xf32>
    %16 = math.rsqrt %15 : vector<16x1xf32>
    %17 = vector.broadcast %16 : vector<16x1xf32> to vector<16x32xf32>
    %18 = arith.mulf %13, %17 : vector<16x32xf32>
    %c0_5 = arith.constant 0 : index
    %c0_6 = arith.constant 0 : index
    %19 = vector.load %arg2[%c0_5, %c0_6] : memref<1x32xf32, #tpu.memory_space<vmem>>, vector<1x32xf32>
    %20 = vector.broadcast %19 : vector<1x32xf32> to vector<16x32xf32>
    %21 = arith.mulf %18, %20 : vector<16x32xf32>
    %c0_7 = arith.constant 0 : index
    %c0_8 = arith.constant 0 : index
    %22 = vector.load %arg3[%c0_7, %c0_8] : memref<1x32xf32, #tpu.memory_space<vmem>>, vector<1x32xf32>
    %23 = vector.broadcast %22 : vector<1x32xf32> to vector<16x32xf32>
    %24 = arith.addf %21, %23 : vector<16x32xf32>
    %c0_9 = arith.constant 0 : index
    %c0_10 = arith.constant 0 : index
    %25 = vector.load %arg4[%c0_9, %c0_10] : memref<16x32xf32, #tpu.memory_space<vmem>>, vector<16x32xf32>
    tpu.vector_store %arg4[%c0_9, %c0_10], %24 {strides = array<i32>} : memref<16x32xf32, #tpu.memory_space<vmem>>, vector<16x32xf32>,
    return
  }
  func.func @transform_0(%arg0: i32) -> (i32, i32) {
    %c0_i32 = arith.constant 0 : i32
    %c0_i32_0 = arith.constant 0 : i32
    return %arg0, %c0_i32 : i32, i32
  }
  func.func @transform_1(%arg0: i32) -> (i32, i32) {
    %c0_i32 = arith.constant 0 : i32
    %c0_i32_0 = arith.constant 0 : i32
    %c0_i32_1 = arith.constant 0 : i32
    return %c0_i32, %c0_i32_0 : i32, i32
  }
  func.func @transform_2(%arg0: i32) -> (i32, i32) {
    %c0_i32 = arith.constant 0 : i32
    %c0_i32_0 = arith.constant 0 : i32
    %c0_i32_1 = arith.constant 0 : i32
    return %c0_i32, %c0_i32_0 : i32, i32
  }
  func.func @transform_3(%arg0: i32) -> (i32, i32) {
    %c0_i32 = arith.constant 0 : i32
    %c0_i32_0 = arith.constant 0 : i32
    return %arg0, %c0_i32 : i32, i32
  }
}

module attributes {stable_mosaic.version = 11 : i64} {
  func.func @linear_add_ln_kernel(%arg0: i32, %arg1: i32, %arg2: memref<16x32xf32, #tpu.memory_space<vmem>>, %arg3: memref<32x32xbf16, #tpu.memory_space<vmem>>, %arg4: memref<1x32xf32, #tpu.memory_space<vmem>>, %arg5: memref<16x32xf32, #tpu.memory_space<vmem>>, %arg6: memref<1x32xf32, #tpu.memory_space<vmem>>, %arg7: memref<1x32xf32, #tpu.memory_space<vmem>>, %arg8: memref<16x32xf32, #tpu.memory_space<vmem>>, %arg9: memref<16x32xf32, #tpu.memory_space<vmem>>) attributes {dimension_semantics = [#tpu.dimension_semantics<parallel>, #tpu.dimension_semantics<arbitrary>], iteration_bounds = array<i64: 1, 1>, scalar_prefetch = 0 : i64, scratch_operands = 1 : i64, tpu.core_type = #tpu.core_type<tc>, window_params = [{transform_indices = @transform_0, window_bounds = array<i64: 16, 32>}, {transform_indices = @transform_1, window_bounds = array<i64: 32, 32>}, {pipeline_mode = #tpu.pipeline_mode<synchronous>, transform_indices = @transform_2, window_bounds = array<i64: 1, 32>}, {transform_indices = @transform_3, window_bounds = array<i64: 16, 32>}, {pipeline_mode = #tpu.pipeline_mode<synchronous>, transform_indices = @transform_4, window_bounds = array<i64: 1, 32>}, {pipeline_mode = #tpu.pipeline_mode<synchronous>, transform_indices = @transform_5, window_bounds = array<i64: 1, 32>}, {transform_indices = @transform_6, window_bounds = array<i64: 16, 32>}]} {
    %c0_i32 = arith.constant 0 : i32
    %0 = arith.cmpi eq, %arg1, %c0_i32 : i32
    %1 = arith.extui %0 : i1 to i32
    %c0_i32_0 = arith.constant 0 : i32
    %2 = arith.cmpi ne, %1, %c0_i32_0 : i32
    scf.if %2 {
      %cst_10 = arith.constant 0.000000e+00 : f32
      %13 = vector.broadcast %cst_10 : f32 to vector<16x32xf32>
      %c0_11 = arith.constant 0 : index
      %c0_12 = arith.constant 0 : index
      %14 = vector.load %arg9[%c0_11, %c0_12] : memref<16x32xf32, #tpu.memory_space<vmem>>, vector<16x32xf32>
      tpu.vector_store %arg9[%c0_11, %c0_12], %13 {strides = array<i32>} : memref<16x32xf32, #tpu.memory_space<vmem>>, vector<16x32xf32>,
    } else {
    }
    %c0 = arith.constant 0 : index
    %c0_1 = arith.constant 0 : index
    %3 = vector.load %arg9[%c0, %c0_1] : memref<16x32xf32, #tpu.memory_space<vmem>>, vector<16x32xf32>
    %c0_2 = arith.constant 0 : index
    %c0_3 = arith.constant 0 : index
    %4 = vector.load %arg2[%c0_2, %c0_3] : memref<16x32xf32, #tpu.memory_space<vmem>>, vector<16x32xf32>
    %5 = arith.truncf %4 : vector<16x32xf32> to vector<16x32xbf16>
    %c0_4 = arith.constant 0 : index
    %c0_5 = arith.constant 0 : index
    %6 = vector.load %arg3[%c0_4, %c0_5] : memref<32x32xbf16, #tpu.memory_space<vmem>>, vector<32x32xbf16>
    %cst = arith.constant dense<0.000000e+00> : vector<16x32xf32>
    %7 = tpu.matmul %5, %6, %cst {dimension_numbers = #tpu.dot_dimension_numbers<[1], [0], [0], [1], [0, 0, 1, 1], [], []>} : vector<16x32xbf16>, vector<32x32xbf16>, vector<16x32xf32> -> vector<16x32xf32>
    %8 = arith.addf %3, %7 : vector<16x32xf32>
    %c0_6 = arith.constant 0 : index
    %c0_7 = arith.constant 0 : index
    %9 = vector.load %arg9[%c0_6, %c0_7] : memref<16x32xf32, #tpu.memory_space<vmem>>, vector<16x32xf32>
    tpu.vector_store %arg9[%c0_6, %c0_7], %8 {strides = array<i32>} : memref<16x32xf32, #tpu.memory_space<vmem>>, vector<16x32xf32>,
    %c0_i32_8 = arith.constant 0 : i32
    %10 = arith.cmpi eq, %arg1, %c0_i32_8 : i32
    %11 = arith.extui %10 : i1 to i32
    %c0_i32_9 = arith.constant 0 : i32
    %12 = arith.cmpi ne, %11, %c0_i32_9 : i32
    scf.if %12 {
      %c0_10 = arith.constant 0 : index
      %c0_11 = arith.constant 0 : index
      %13 = vector.load %arg5[%c0_10, %c0_11] : memref<16x32xf32, #tpu.memory_space<vmem>>, vector<16x32xf32>
      %c0_12 = arith.constant 0 : index
      %c0_13 = arith.constant 0 : index
      %14 = vector.load %arg9[%c0_12, %c0_13] : memref<16x32xf32, #tpu.memory_space<vmem>>, vector<16x32xf32>
      %15 = arith.addf %13, %14 : vector<16x32xf32>
      %c0_14 = arith.constant 0 : index
      %c0_15 = arith.constant 0 : index
      %16 = vector.load %arg4[%c0_14, %c0_15] : memref<1x32xf32, #tpu.memory_space<vmem>>, vector<1x32xf32>
      %17 = vector.broadcast %16 : vector<1x32xf32> to vector<16x32xf32>
      %18 = arith.addf %15, %17 : vector<16x32xf32>
      %cst_16 = arith.constant dense<0.000000e+00> : vector<16xf32>
      %19 = vector.multi_reduction <add>, %18, %cst_16 [1] : vector<16x32xf32> to vector<16xf32>
      %20 = vector.shape_cast %19 : vector<16xf32> to vector<16x1xf32>
      %cst_17 = arith.constant 3.200000e+01 : f32
      %21 = vector.broadcast %cst_17 : f32 to vector<16x1xf32>
      %22 = arith.divf %20, %21 : vector<16x1xf32>
      %23 = vector.broadcast %22 : vector<16x1xf32> to vector<16x32xf32>
      %24 = arith.subf %18, %23 : vector<16x32xf32>
      %25 = arith.mulf %24, %24 : vector<16x32xf32>
      %cst_18 = arith.constant dense<0.000000e+00> : vector<16xf32>
      %26 = vector.multi_reduction <add>, %25, %cst_18 [1] : vector<16x32xf32> to vector<16xf32>
      %27 = vector.shape_cast %26 : vector<16xf32> to vector<16x1xf32>
      %cst_19 = arith.constant 3.200000e+01 : f32
      %28 = vector.broadcast %cst_19 : f32 to vector<16x1xf32>
      %29 = arith.divf %27, %28 : vector<16x1xf32>
      %30 = vector.broadcast %22 : vector<16x1xf32> to vector<16x32xf32>
      %31 = arith.subf %18, %30 : vector<16x32xf32>
      %cst_20 = arith.constant 9.99999974E-6 : f32
      %32 = vector.broadcast %cst_20 : f32 to vector<16x1xf32>
      %33 = arith.addf %29, %32 : vector<16x1xf32>
      %34 = math.rsqrt %33 : vector<16x1xf32>
      %35 = vector.broadcast %34 : vector<16x1xf32> to vector<16x32xf32>
      %36 = arith.mulf %31, %35 : vector<16x32xf32>
      %c0_21 = arith.constant 0 : index
      %c0_22 = arith.constant 0 : index
      %37 = vector.load %arg6[%c0_21, %c0_22] : memref<1x32xf32, #tpu.memory_space<vmem>>, vector<1x32xf32>
      %38 = vector.broadcast %37 : vector<1x32xf32> to vector<16x32xf32>
      %39 = arith.mulf %36, %38 : vector<16x32xf32>
      %c0_23 = arith.constant 0 : index
      %c0_24 = arith.constant 0 : index
      %40 = vector.load %arg7[%c0_23, %c0_24] : memref<1x32xf32, #tpu.memory_space<vmem>>, vector<1x32xf32>
      %41 = vector.broadcast %40 : vector<1x32xf32> to vector<16x32xf32>
      %42 = arith.addf %39, %41 : vector<16x32xf32>
      %c0_25 = arith.constant 0 : index
      %c0_26 = arith.constant 0 : index
      %43 = vector.load %arg8[%c0_25, %c0_26] : memref<16x32xf32, #tpu.memory_space<vmem>>, vector<16x32xf32>
      tpu.vector_store %arg8[%c0_25, %c0_26], %42 {strides = array<i32>} : memref<16x32xf32, #tpu.memory_space<vmem>>, vector<16x32xf32>,
    } else {
    }
    return
  }
  func.func @transform_0(%arg0: i32, %arg1: i32) -> (i32, i32) {
    %c0_i32 = arith.constant 0 : i32
    return %arg0, %arg1 : i32, i32
  }
  func.func @transform_1(%arg0: i32, %arg1: i32) -> (i32, i32) {
    %c0_i32 = arith.constant 0 : i32
    %c0_i32_0 = arith.constant 0 : i32
    return %arg1, %c0_i32 : i32, i32
  }
  func.func @transform_2(%arg0: i32, %arg1: i32) -> (i32, i32) {
    %c0_i32 = arith.constant 0 : i32
    %c0_i32_0 = arith.constant 0 : i32
    %c0_i32_1 = arith.constant 0 : i32
    return %c0_i32, %c0_i32_0 : i32, i32
  }
  func.func @transform_3(%arg0: i32, %arg1: i32) -> (i32, i32) {
    %c0_i32 = arith.constant 0 : i32
    %c0_i32_0 = arith.constant 0 : i32
    return %arg0, %c0_i32 : i32, i32
  }
  func.func @transform_4(%arg0: i32, %arg1: i32) -> (i32, i32) {
    %c0_i32 = arith.constant 0 : i32
    %c0_i32_0 = arith.constant 0 : i32
    %c0_i32_1 = arith.constant 0 : i32
    return %c0_i32, %c0_i32_0 : i32, i32
  }
  func.func @transform_5(%arg0: i32, %arg1: i32) -> (i32, i32) {
    %c0_i32 = arith.constant 0 : i32
    %c0_i32_0 = arith.constant 0 : i32
    %c0_i32_1 = arith.constant 0 : i32
    return %c0_i32, %c0_i32_0 : i32, i32
  }
  func.func @transform_6(%arg0: i32, %arg1: i32) -> (i32, i32) {
    %c0_i32 = arith.constant 0 : i32
    %c0_i32_0 = arith.constant 0 : i32
    return %arg0, %c0_i32 : i32, i32
  }
}

module attributes {stable_mosaic.version = 11 : i64} {
  func.func @attn_kernel(%arg0: i32, %arg1: memref<1x8x96xf32, #tpu.memory_space<vmem>>, %arg2: memref<1x8x32xf32, #tpu.memory_space<vmem>>) attributes {dimension_semantics = [#tpu.dimension_semantics<parallel>], iteration_bounds = array<i64: 2>, scalar_prefetch = 0 : i64, scratch_operands = 0 : i64, tpu.core_type = #tpu.core_type<tc>, window_params = [{transform_indices = @transform_0, window_bounds = array<i64: 1, 8, 96>}, {transform_indices = @transform_1, window_bounds = array<i64: 1, 8, 32>}]} {
    %c0 = arith.constant 0 : index
    %c0_0 = arith.constant 0 : index
    %c0_1 = arith.constant 0 : index
    %0 = vector.load %arg1[%c0, %c0_0, %c0_1] : memref<1x8x96xf32, #tpu.memory_space<vmem>>, vector<1x8x96xf32>
    %1 = vector.shape_cast %0 : vector<1x8x96xf32> to vector<8x96xf32>
    %2 = vector.extract_strided_slice %1 {offsets = [0, 0], sizes = [8, 16], strides = [1, 1]} : vector<8x96xf32> to vector<8x16xf32>
    %3 = arith.truncf %2 : vector<8x16xf32> to vector<8x16xbf16>
    %4 = vector.extract_strided_slice %1 {offsets = [0, 32], sizes = [8, 16], strides = [1, 1]} : vector<8x96xf32> to vector<8x16xf32>
    %5 = arith.truncf %4 : vector<8x16xf32> to vector<8x16xbf16>
    %6 = vector.extract_strided_slice %1 {offsets = [0, 64], sizes = [8, 16], strides = [1, 1]} : vector<8x96xf32> to vector<8x16xf32>
    %7 = arith.truncf %6 : vector<8x16xf32> to vector<8x16xbf16>
    %cst = arith.constant dense<0.000000e+00> : vector<8x8xf32>
    %8 = tpu.matmul %3, %5, %cst {dimension_numbers = #tpu.dot_dimension_numbers<[1], [1], [0], [0], [0, 0, 1, 0], [], []>} : vector<8x16xbf16>, vector<8x16xbf16>, vector<8x8xf32> -> vector<8x8xf32>
    %cst_2 = arith.constant dense<0xFF800000> : vector<8xf32>
    %9 = vector.multi_reduction <maximumf>, %8, %cst_2 [1] : vector<8x8xf32> to vector<8xf32>
    %10 = vector.shape_cast %9 : vector<8xf32> to vector<8x1xf32>
    %11 = vector.broadcast %10 : vector<8x1xf32> to vector<8x8xf32>
    %12 = arith.subf %8, %11 : vector<8x8xf32>
    %13 = math.exp %12 : vector<8x8xf32>
    %cst_3 = arith.constant dense<0.000000e+00> : vector<8xf32>
    %14 = vector.multi_reduction <add>, %13, %cst_3 [1] : vector<8x8xf32> to vector<8xf32>
    %15 = vector.shape_cast %14 : vector<8xf32> to vector<8x1xf32>
    %16 = tpu.reciprocal %15 {approx = true} : vector<8x1xf32> -> vector<8x1xf32>
    %17 = vector.broadcast %16 : vector<8x1xf32> to vector<8x8xf32>
    %18 = arith.mulf %13, %17 : vector<8x8xf32>
    %19 = arith.truncf %18 : vector<8x8xf32> to vector<8x8xbf16>
    %cst_4 = arith.constant dense<0.000000e+00> : vector<8x16xf32>
    %20 = tpu.matmul %19, %7, %cst_4 {dimension_numbers = #tpu.dot_dimension_numbers<[1], [0], [0], [1], [0, 0, 1, 1], [], []>} : vector<8x8xbf16>, vector<8x16xbf16>, vector<8x16xf32> -> vector<8x16xf32>
    %c0_5 = arith.constant 0 : index
    %c0_6 = arith.constant 0 : index
    %c0_7 = arith.constant 0 : index
    %21 = vector.load %arg2[%c0_5, %c0_6, %c0_7] : memref<1x8x32xf32, #tpu.memory_space<vmem>>, vector<1x8x16xf32>
    %22 = vector.shape_cast %21 : vector<1x8x16xf32> to vector<8x16xf32>
    %23 = vector.shape_cast %20 : vector<8x16xf32> to vector<1x8x16xf32>
    tpu.vector_store %arg2[%c0_5, %c0_6, %c0_7], %23 {strides = array<i32>} : memref<1x8x32xf32, #tpu.memory_space<vmem>>, vector<1x8x16xf32>,
    %24 = vector.extract_strided_slice %1 {offsets = [0, 16], sizes = [8, 16], strides = [1, 1]} : vector<8x96xf32> to vector<8x16xf32>
    %25 = arith.truncf %24 : vector<8x16xf32> to vector<8x16xbf16>
    %26 = vector.extract_strided_slice %1 {offsets = [0, 48], sizes = [8, 16], strides = [1, 1]} : vector<8x96xf32> to vector<8x16xf32>
    %27 = arith.truncf %26 : vector<8x16xf32> to vector<8x16xbf16>
    %28 = vector.extract_strided_slice %1 {offsets = [0, 80], sizes = [8, 16], strides = [1, 1]} : vector<8x96xf32> to vector<8x16xf32>
    %29 = arith.truncf %28 : vector<8x16xf32> to vector<8x16xbf16>
    %cst_8 = arith.constant dense<0.000000e+00> : vector<8x8xf32>
    %30 = tpu.matmul %25, %27, %cst_8 {dimension_numbers = #tpu.dot_dimension_numbers<[1], [1], [0], [0], [0, 0, 1, 0], [], []>} : vector<8x16xbf16>, vector<8x16xbf16>, vector<8x8xf32> -> vector<8x8xf32>
    %cst_9 = arith.constant dense<0xFF800000> : vector<8xf32>
    %31 = vector.multi_reduction <maximumf>, %30, %cst_9 [1] : vector<8x8xf32> to vector<8xf32>
    %32 = vector.shape_cast %31 : vector<8xf32> to vector<8x1xf32>
    %33 = vector.broadcast %32 : vector<8x1xf32> to vector<8x8xf32>
    %34 = arith.subf %30, %33 : vector<8x8xf32>
    %35 = math.exp %34 : vector<8x8xf32>
    %cst_10 = arith.constant dense<0.000000e+00> : vector<8xf32>
    %36 = vector.multi_reduction <add>, %35, %cst_10 [1] : vector<8x8xf32> to vector<8xf32>
    %37 = vector.shape_cast %36 : vector<8xf32> to vector<8x1xf32>
    %38 = tpu.reciprocal %37 {approx = true} : vector<8x1xf32> -> vector<8x1xf32>
    %39 = vector.broadcast %38 : vector<8x1xf32> to vector<8x8xf32>
    %40 = arith.mulf %35, %39 : vector<8x8xf32>
    %41 = arith.truncf %40 : vector<8x8xf32> to vector<8x8xbf16>
    %cst_11 = arith.constant dense<0.000000e+00> : vector<8x16xf32>
    %42 = tpu.matmul %41, %29, %cst_11 {dimension_numbers = #tpu.dot_dimension_numbers<[1], [0], [0], [1], [0, 0, 1, 1], [], []>} : vector<8x8xbf16>, vector<8x16xbf16>, vector<8x16xf32> -> vector<8x16xf32>
    %c0_12 = arith.constant 0 : index
    %c0_13 = arith.constant 0 : index
    %c16 = arith.constant 16 : index
    %43 = vector.load %arg2[%c0_12, %c0_13, %c16] : memref<1x8x32xf32, #tpu.memory_space<vmem>>, vector<1x8x16xf32>
    %44 = vector.shape_cast %43 : vector<1x8x16xf32> to vector<8x16xf32>
    %45 = vector.shape_cast %42 : vector<8x16xf32> to vector<1x8x16xf32>
    tpu.vector_store %arg2[%c0_12, %c0_13, %c16], %45 {strides = array<i32>} : memref<1x8x32xf32, #tpu.memory_space<vmem>>, vector<1x8x16xf32>,
    return
  }
  func.func @transform_0(%arg0: i32) -> (i32, i32, i32) {
    %c0_i32 = arith.constant 0 : i32
    %c0_i32_0 = arith.constant 0 : i32
    %c0_i32_1 = arith.constant 0 : i32
    return %arg0, %c0_i32, %c0_i32_0 : i32, i32, i32
  }
  func.func @transform_1(%arg0: i32) -> (i32, i32, i32) {
    %c0_i32 = arith.constant 0 : i32
    %c0_i32_0 = arith.constant 0 : i32
    %c0_i32_1 = arith.constant 0 : i32
    return %arg0, %c0_i32, %c0_i32_0 : i32, i32, i32
  }
}

module attributes {stable_mosaic.version = 11 : i64} {
  func.func @linear_add_ln_kernel(%arg0: i32, %arg1: i32, %arg2: memref<16x64xf32, #tpu.memory_space<vmem>>, %arg3: memref<64x32xbf16, #tpu.memory_space<vmem>>, %arg4: memref<1x32xf32, #tpu.memory_space<vmem>>, %arg5: memref<16x32xf32, #tpu.memory_space<vmem>>, %arg6: memref<1x32xf32, #tpu.memory_space<vmem>>, %arg7: memref<1x32xf32, #tpu.memory_space<vmem>>, %arg8: memref<16x32xf32, #tpu.memory_space<vmem>>, %arg9: memref<16x32xf32, #tpu.memory_space<vmem>>) attributes {dimension_semantics = [#tpu.dimension_semantics<parallel>, #tpu.dimension_semantics<arbitrary>], iteration_bounds = array<i64: 1, 1>, scalar_prefetch = 0 : i64, scratch_operands = 1 : i64, tpu.core_type = #tpu.core_type<tc>, window_params = [{transform_indices = @transform_0, window_bounds = array<i64: 16, 64>}, {transform_indices = @transform_1, window_bounds = array<i64: 64, 32>}, {pipeline_mode = #tpu.pipeline_mode<synchronous>, transform_indices = @transform_2, window_bounds = array<i64: 1, 32>}, {transform_indices = @transform_3, window_bounds = array<i64: 16, 32>}, {pipeline_mode = #tpu.pipeline_mode<synchronous>, transform_indices = @transform_4, window_bounds = array<i64: 1, 32>}, {pipeline_mode = #tpu.pipeline_mode<synchronous>, transform_indices = @transform_5, window_bounds = array<i64: 1, 32>}, {transform_indices = @transform_6, window_bounds = array<i64: 16, 32>}]} {
    %c0_i32 = arith.constant 0 : i32
    %0 = arith.cmpi eq, %arg1, %c0_i32 : i32
    %1 = arith.extui %0 : i1 to i32
    %c0_i32_0 = arith.constant 0 : i32
    %2 = arith.cmpi ne, %1, %c0_i32_0 : i32
    scf.if %2 {
      %cst_10 = arith.constant 0.000000e+00 : f32
      %13 = vector.broadcast %cst_10 : f32 to vector<16x32xf32>
      %c0_11 = arith.constant 0 : index
      %c0_12 = arith.constant 0 : index
      %14 = vector.load %arg9[%c0_11, %c0_12] : memref<16x32xf32, #tpu.memory_space<vmem>>, vector<16x32xf32>
      tpu.vector_store %arg9[%c0_11, %c0_12], %13 {strides = array<i32>} : memref<16x32xf32, #tpu.memory_space<vmem>>, vector<16x32xf32>,
    } else {
    }
    %c0 = arith.constant 0 : index
    %c0_1 = arith.constant 0 : index
    %3 = vector.load %arg9[%c0, %c0_1] : memref<16x32xf32, #tpu.memory_space<vmem>>, vector<16x32xf32>
    %c0_2 = arith.constant 0 : index
    %c0_3 = arith.constant 0 : index
    %4 = vector.load %arg2[%c0_2, %c0_3] : memref<16x64xf32, #tpu.memory_space<vmem>>, vector<16x64xf32>
    %5 = arith.truncf %4 : vector<16x64xf32> to vector<16x64xbf16>
    %c0_4 = arith.constant 0 : index
    %c0_5 = arith.constant 0 : index
    %6 = vector.load %arg3[%c0_4, %c0_5] : memref<64x32xbf16, #tpu.memory_space<vmem>>, vector<64x32xbf16>
    %cst = arith.constant dense<0.000000e+00> : vector<16x32xf32>
    %7 = tpu.matmul %5, %6, %cst {dimension_numbers = #tpu.dot_dimension_numbers<[1], [0], [0], [1], [0, 0, 1, 1], [], []>} : vector<16x64xbf16>, vector<64x32xbf16>, vector<16x32xf32> -> vector<16x32xf32>
    %8 = arith.addf %3, %7 : vector<16x32xf32>
    %c0_6 = arith.constant 0 : index
    %c0_7 = arith.constant 0 : index
    %9 = vector.load %arg9[%c0_6, %c0_7] : memref<16x32xf32, #tpu.memory_space<vmem>>, vector<16x32xf32>
    tpu.vector_store %arg9[%c0_6, %c0_7], %8 {strides = array<i32>} : memref<16x32xf32, #tpu.memory_space<vmem>>, vector<16x32xf32>,
    %c0_i32_8 = arith.constant 0 : i32
    %10 = arith.cmpi eq, %arg1, %c0_i32_8 : i32
    %11 = arith.extui %10 : i1 to i32
    %c0_i32_9 = arith.constant 0 : i32
    %12 = arith.cmpi ne, %11, %c0_i32_9 : i32
    scf.if %12 {
      %c0_10 = arith.constant 0 : index
      %c0_11 = arith.constant 0 : index
      %13 = vector.load %arg5[%c0_10, %c0_11] : memref<16x32xf32, #tpu.memory_space<vmem>>, vector<16x32xf32>
      %c0_12 = arith.constant 0 : index
      %c0_13 = arith.constant 0 : index
      %14 = vector.load %arg9[%c0_12, %c0_13] : memref<16x32xf32, #tpu.memory_space<vmem>>, vector<16x32xf32>
      %15 = arith.addf %13, %14 : vector<16x32xf32>
      %c0_14 = arith.constant 0 : index
      %c0_15 = arith.constant 0 : index
      %16 = vector.load %arg4[%c0_14, %c0_15] : memref<1x32xf32, #tpu.memory_space<vmem>>, vector<1x32xf32>
      %17 = vector.broadcast %16 : vector<1x32xf32> to vector<16x32xf32>
      %18 = arith.addf %15, %17 : vector<16x32xf32>
      %cst_16 = arith.constant dense<0.000000e+00> : vector<16xf32>
      %19 = vector.multi_reduction <add>, %18, %cst_16 [1] : vector<16x32xf32> to vector<16xf32>
      %20 = vector.shape_cast %19 : vector<16xf32> to vector<16x1xf32>
      %cst_17 = arith.constant 3.200000e+01 : f32
      %21 = vector.broadcast %cst_17 : f32 to vector<16x1xf32>
      %22 = arith.divf %20, %21 : vector<16x1xf32>
      %23 = vector.broadcast %22 : vector<16x1xf32> to vector<16x32xf32>
      %24 = arith.subf %18, %23 : vector<16x32xf32>
      %25 = arith.mulf %24, %24 : vector<16x32xf32>
      %cst_18 = arith.constant dense<0.000000e+00> : vector<16xf32>
      %26 = vector.multi_reduction <add>, %25, %cst_18 [1] : vector<16x32xf32> to vector<16xf32>
      %27 = vector.shape_cast %26 : vector<16xf32> to vector<16x1xf32>
      %cst_19 = arith.constant 3.200000e+01 : f32
      %28 = vector.broadcast %cst_19 : f32 to vector<16x1xf32>
      %29 = arith.divf %27, %28 : vector<16x1xf32>
      %30 = vector.broadcast %22 : vector<16x1xf32> to vector<16x32xf32>
      %31 = arith.subf %18, %30 : vector<16x32xf32>
      %cst_20 = arith.constant 9.99999974E-6 : f32
      %32 = vector.broadcast %cst_20 : f32 to vector<16x1xf32>
      %33 = arith.addf %29, %32 : vector<16x1xf32>
      %34 = math.rsqrt %33 : vector<16x1xf32>
      %35 = vector.broadcast %34 : vector<16x1xf32> to vector<16x32xf32>
      %36 = arith.mulf %31, %35 : vector<16x32xf32>
      %c0_21 = arith.constant 0 : index
      %c0_22 = arith.constant 0 : index
      %37 = vector.load %arg6[%c0_21, %c0_22] : memref<1x32xf32, #tpu.memory_space<vmem>>, vector<1x32xf32>
      %38 = vector.broadcast %37 : vector<1x32xf32> to vector<16x32xf32>
      %39 = arith.mulf %36, %38 : vector<16x32xf32>
      %c0_23 = arith.constant 0 : index
      %c0_24 = arith.constant 0 : index
      %40 = vector.load %arg7[%c0_23, %c0_24] : memref<1x32xf32, #tpu.memory_space<vmem>>, vector<1x32xf32>
      %41 = vector.broadcast %40 : vector<1x32xf32> to vector<16x32xf32>
      %42 = arith.addf %39, %41 : vector<16x32xf32>
      %c0_25 = arith.constant 0 : index
      %c0_26 = arith.constant 0 : index
      %43 = vector.load %arg8[%c0_25, %c0_26] : memref<16x32xf32, #tpu.memory_space<vmem>>, vector<16x32xf32>
      tpu.vector_store %arg8[%c0_25, %c0_26], %42 {strides = array<i32>} : memref<16x32xf32, #tpu.memory_space<vmem>>, vector<16x32xf32>,
    } else {
    }
    return
  }
  func.func @transform_0(%arg0: i32, %arg1: i32) -> (i32, i32) {
    %c0_i32 = arith.constant 0 : i32
    return %arg0, %arg1 : i32, i32
  }
  func.func @transform_1(%arg0: i32, %arg1: i32) -> (i32, i32) {
    %c0_i32 = arith.constant 0 : i32
    %c0_i32_0 = arith.constant 0 : i32
    return %arg1, %c0_i32 : i32, i32
  }
  func.func @transform_2(%arg0: i32, %arg1: i32) -> (i32, i32) {
    %c0_i32 = arith.constant 0 : i32
    %c0_i32_0 = arith.constant 0 : i32
    %c0_i32_1 = arith.constant 0 : i32
    return %c0_i32, %c0_i32_0 : i32, i32
  }
  func.func @transform_3(%arg0: i32, %arg1: i32) -> (i32, i32) {
    %c0_i32 = arith.constant 0 : i32
    %c0_i32_0 = arith.constant 0 : i32
    return %arg0, %c0_i32 : i32, i32
  }
  func.func @transform_4(%arg0: i32, %arg1: i32) -> (i32, i32) {
    %c0_i32 = arith.constant 0 : i32
    %c0_i32_0 = arith.constant 0 : i32
    %c0_i32_1 = arith.constant 0 : i32
    return %c0_i32, %c0_i32_0 : i32, i32
  }
  func.func @transform_5(%arg0: i32, %arg1: i32) -> (i32, i32) {
    %c0_i32 = arith.constant 0 : i32
    %c0_i32_0 = arith.constant 0 : i32
    %c0_i32_1 = arith.constant 0 : i32
    return %c0_i32, %c0_i32_0 : i32, i32
  }
  func.func @transform_6(%arg0: i32, %arg1: i32) -> (i32, i32) {
    %c0_i32 = arith.constant 0 : i32
    %c0_i32_0 = arith.constant 0 : i32
    return %arg0, %c0_i32 : i32, i32
  }
}

module attributes {stable_mosaic.version = 11 : i64} {
  func.func @matmul_kernel(%arg0: i32, %arg1: i32, %arg2: i32, %arg3: memref<16x32xf32, #tpu.memory_space<vmem>>, %arg4: memref<32x64xbf16, #tpu.memory_space<vmem>>, %arg5: memref<1x64xf32, #tpu.memory_space<vmem>>, %arg6: memref<16x64xf32, #tpu.memory_space<vmem>>, %arg7: memref<16x64xf32, #tpu.memory_space<vmem>>) attributes {dimension_semantics = [#tpu.dimension_semantics<parallel>, #tpu.dimension_semantics<parallel>, #tpu.dimension_semantics<arbitrary>], iteration_bounds = array<i64: 1, 1, 1>, scalar_prefetch = 0 : i64, scratch_operands = 1 : i64, tpu.core_type = #tpu.core_type<tc>, window_params = [{transform_indices = @transform_0, window_bounds = array<i64: 16, 32>}, {transform_indices = @transform_1, window_bounds = array<i64: 32, 64>}, {transform_indices = @transform_2, window_bounds = array<i64: 1, 64>}, {transform_indices = @transform_3, window_bounds = array<i64: 16, 64>}]} {
    %c0_i32 = arith.constant 0 : i32
    %0 = arith.cmpi eq, %arg2, %c0_i32 : i32
    %1 = arith.extui %0 : i1 to i32
    %c0_i32_0 = arith.constant 0 : i32
    %2 = arith.cmpi ne, %1, %c0_i32_0 : i32
    scf.if %2 {
      %cst_10 = arith.constant 0.000000e+00 : f32
      %13 = vector.broadcast %cst_10 : f32 to vector<16x64xf32>
      %c0_11 = arith.constant 0 : index
      %c0_12 = arith.constant 0 : index
      %14 = vector.load %arg7[%c0_11, %c0_12] : memref<16x64xf32, #tpu.memory_space<vmem>>, vector<16x64xf32>
      tpu.vector_store %arg7[%c0_11, %c0_12], %13 {strides = array<i32>} : memref<16x64xf32, #tpu.memory_space<vmem>>, vector<16x64xf32>,
    } else {
    }
    %c0 = arith.constant 0 : index
    %c0_1 = arith.constant 0 : index
    %3 = vector.load %arg7[%c0, %c0_1] : memref<16x64xf32, #tpu.memory_space<vmem>>, vector<16x64xf32>
    %c0_2 = arith.constant 0 : index
    %c0_3 = arith.constant 0 : index
    %4 = vector.load %arg3[%c0_2, %c0_3] : memref<16x32xf32, #tpu.memory_space<vmem>>, vector<16x32xf32>
    %5 = arith.truncf %4 : vector<16x32xf32> to vector<16x32xbf16>
    %c0_4 = arith.constant 0 : index
    %c0_5 = arith.constant 0 : index
    %6 = vector.load %arg4[%c0_4, %c0_5] : memref<32x64xbf16, #tpu.memory_space<vmem>>, vector<32x64xbf16>
    %cst = arith.constant dense<0.000000e+00> : vector<16x64xf32>
    %7 = tpu.matmul %5, %6, %cst {dimension_numbers = #tpu.dot_dimension_numbers<[1], [0], [0], [1], [0, 0, 1, 1], [], []>} : vector<16x32xbf16>, vector<32x64xbf16>, vector<16x64xf32> -> vector<16x64xf32>
    %8 = arith.addf %3, %7 : vector<16x64xf32>
    %c0_6 = arith.constant 0 : index
    %c0_7 = arith.constant 0 : index
    %9 = vector.load %arg7[%c0_6, %c0_7] : memref<16x64xf32, #tpu.memory_space<vmem>>, vector<16x64xf32>
    tpu.vector_store %arg7[%c0_6, %c0_7], %8 {strides = array<i32>} : memref<16x64xf32, #tpu.memory_space<vmem>>, vector<16x64xf32>,
    %c0_i32_8 = arith.constant 0 : i32
    %10 = arith.cmpi eq, %arg2, %c0_i32_8 : i32
    %11 = arith.extui %10 : i1 to i32
    %c0_i32_9 = arith.constant 0 : i32
    %12 = arith.cmpi ne, %11, %c0_i32_9 : i32
    scf.if %12 {
      %c0_10 = arith.constant 0 : index
      %c0_11 = arith.constant 0 : index
      %13 = vector.load %arg7[%c0_10, %c0_11] : memref<16x64xf32, #tpu.memory_space<vmem>>, vector<16x64xf32>
      %c0_12 = arith.constant 0 : index
      %c0_13 = arith.constant 0 : index
      %14 = vector.load %arg5[%c0_12, %c0_13] : memref<1x64xf32, #tpu.memory_space<vmem>>, vector<1x64xf32>
      %15 = vector.broadcast %14 : vector<1x64xf32> to vector<16x64xf32>
      %16 = arith.addf %13, %15 : vector<16x64xf32>
      %cst_14 = arith.constant 5.000000e-01 : f32
      %17 = vector.broadcast %cst_14 : f32 to vector<16x64xf32>
      %18 = arith.mulf %17, %16 : vector<16x64xf32>
      %cst_15 = arith.constant 0.707106769 : f32
      %19 = vector.broadcast %cst_15 : f32 to vector<16x64xf32>
      %20 = arith.mulf %16, %19 : vector<16x64xf32>
      %21 = math.erf %20 : vector<16x64xf32>
      %cst_16 = arith.constant 1.000000e+00 : f32
      %22 = vector.broadcast %cst_16 : f32 to vector<16x64xf32>
      %23 = arith.addf %22, %21 : vector<16x64xf32>
      %24 = arith.mulf %18, %23 : vector<16x64xf32>
      %c0_17 = arith.constant 0 : index
      %c0_18 = arith.constant 0 : index
      %25 = vector.load %arg6[%c0_17, %c0_18] : memref<16x64xf32, #tpu.memory_space<vmem>>, vector<16x64xf32>
      tpu.vector_store %arg6[%c0_17, %c0_18], %24 {strides = array<i32>} : memref<16x64xf32, #tpu.memory_space<vmem>>, vector<16x64xf32>,
    } else {
    }
    return
  }
  func.func @transform_0(%arg0: i32, %arg1: i32, %arg2: i32) -> (i32, i32) {
    %c0_i32 = arith.constant 0 : i32
    return %arg0, %arg2 : i32, i32
  }
  func.func @transform_1(%arg0: i32, %arg1: i32, %arg2: i32) -> (i32, i32) {
    %c0_i32 = arith.constant 0 : i32
    return %arg2, %arg1 : i32, i32
  }
  func.func @transform_2(%arg0: i32, %arg1: i32, %arg2: i32) -> (i32, i32) {
    %c0_i32 = arith.constant 0 : i32
    %c0_i32_0 = arith.constant 0 : i32
    return %c0_i32, %arg1 : i32, i32
  }
  func.func @transform_3(%arg0: i32, %arg1: i32, %arg2: i32) -> (i32, i32) {
    %c0_i32 = arith.constant 0 : i32
    return %arg0, %arg1 : i32, i32
  }
}

</mosaic_0001>

<bundles_post_ra>
// kernel: bert_model_forward.12
= control target key start
LH: loop header
LB: loop body
LE: loop exit
PB: predicated region body
PF: predicated region fallthrough
CT: control target
= control target key end

     0   :  { %vm19_vm0 = vcmask 785408   ;;  %v132_v0 = vmov 0.0   ;;  %vm133_vm1 = vmmov 0   ;;  %vm43_vm2 = vcmask 261120   ;;  %s181_s1 = inlined_call_operand.vmem [shape: bf16[32,96], index: 1, kind: input, shape index: {}]   ;;  %s182_s0 = inlined_call_operand.vmem [shape: f32[16,32], index: 0, kind: input, shape index: {}]   ;;  %s183_s2 = inlined_call_operand.vmem [shape: f32[1,96], index: 2, kind: input, shape index: {}]   ;;  %s184_s3 = inlined_call_operand.vmem [shape: f32[16,96], index: 3, kind: output, shape index: {}]  }
   0x1   :  { %120 = vmatprep.subr.bf16.mxu0 %v132_v0  ;;  %v130_v1 = vld [vmem:[%s181_s1] sm:$0xff]   ;;  %124 = vmatprep.mubr.msk.bf16.mxu0 %vm133_vm1, %v132_v0  ;;  %20 = vst.msk [vmem:[#allocation2] sm:$0xff] %vm19_vm0, %v132_v0  ;;  %21 = vst.msk [vmem:[#allocation2 + $0x8] sm:$0xff] %vm19_vm0, %v132_v0  ;;  %v131_v2 = vld [vmem:[%s181_s1 + $0x8] sm:$0xff]  }
   0x2   :  { %121 = vmatpush3.bf16.msra.mxu0 %v130_v1  ;;  %v24_v3 = vld [vmem:[%s182_s0] sm:$0xff]  ;;  %v25_v4 = vld [vmem:[%s182_s0 + $0x8] sm:$0xff] }
   0x3   :  { %122 = vmatprep.subr.bf16.mxu0 %v132_v0  ;;  %v26_v5 = vpack.c.bf16 %v25_v4, %v24_v3  ;;  %v116_v14 = vld [vmem:[%s183_s2] ss:$0 sm:$0xff] }
   0x6   :  { %123 = vmatpush3.bf16.msra.mxu0 %v131_v2 }
   0x8   :  { %v22_v6 = vld [vmem:[#allocation2] sm:$0xff]  ;;  %v23_v8 = vld [vmem:[#allocation2 + $0x8] sm:$0xff] }
   0x9   :  { %125 = vmatmul.mubr.msk.bf16.vlgmr.msra.gmra.mrb[0].mxu0 %vm43_vm2, %v26_v5 }
  0xdc   :  { %v81_v7 = vpop.f32.mrb[0].mxu0 }
  0xdd   :  { %v88_v9 = vadd.f32 %v81_v7, %v22_v6  ;;  %v126_v10 = vpop.f32.mrb[1].mxu0 }
  0xde   :  { %v84_v11 = vpop.f32.mrb[2].mxu0 }
  0xdf   :  { %91 = vst.msk [vmem:[#allocation2] sm:$0xff] %vm19_vm0, %v88_v9  ;;  %v89_v12 = vadd.f32 %v84_v11, %v23_v8  ;;  %v127_v13 = vpop.f32.mrb[3].mxu0 }
  0xe1   :  { %92 = vst.msk [vmem:[#allocation2 + $0x8] sm:$0xff] %vm19_vm0, %v89_v12 }
  0xe6   :  { %v96_v15 = vld [vmem:[#allocation2] sm:$0xff] }
  0xe7   :  { %v105_v16 = vadd.f32 %v116_v14, %v96_v15 }
  0xe8   :  { %v97_v17 = vld [vmem:[#allocation2 + $0x8] sm:$0xff] }
  0xe9   :  { %107 = vst.msk [vmem:[%s184_s3] sm:$0xff] %vm19_vm0, %v105_v16  ;;  %v106_v18 = vadd.f32 %v116_v14, %v97_v17 }
  0xeb   :  { %108 = vst.msk [vmem:[%s184_s3 + $0x8] sm:$0xff] %vm19_vm0, %v106_v18 }

// kernel: bert_model_forward.11
= control target key start
LH: loop header
LB: loop body
LE: loop exit
PB: predicated region body
PF: predicated region fallthrough
CT: control target
= control target key end

     0   :  { %vm16_vm0 = vcmask 261120   ;;  %s118_s0 = inlined_call_operand.vmem [shape: f32[16,32], index: 0, kind: input, shape index: {}]   ;;  %s119_s1 = inlined_call_operand.vmem [shape: f32[1,32], index: 1, kind: input, shape index: {}]   ;;  %s120_s2 = inlined_call_operand.vmem [shape: f32[1,32], index: 2, kind: input, shape index: {}]   ;;  %s121_s3 = inlined_call_operand.vmem [shape: f32[16,32], index: 3, kind: output, shape index: {}]  }
   0x1   :  { %v14_v0 = vld [vmem:[%s118_s0] sm:$0xff]  ;;  %v15_v1 = vld [vmem:[%s118_s0 + $0x8] sm:$0xff] }
   0x2   :  { %v17_v2 = vsel %vm16_vm0, %v14_v0, 0.0  ;;  %v20_v3 = vsel %vm16_vm0, %v15_v1, 0.0  ;;  %v68_v21 = vld [vmem:[%s119_s1] ss:$0 sm:$0xff] }
   0x3   :  { %18 = vadd.xlane.f32.xlu0 %v17_v2  ;;  %v69_v23 = vld [vmem:[%s120_s2] ss:$0 sm:$0xff] }
   0x7   :  { %21 = vadd.xlane.f32.xlu0 %v20_v3 }
  0x90   :  { %v19_v4 = vpop.xlane.xlu0 %18 }
  0x91   :  { %v24_v5 = vmul.f32 0.03125, %v19_v4 }
  0x93   :  { %v26_v6 = vsub.f32 %v14_v0, %v24_v5 }
  0x94   :  { %v22_v7 = vpop.xlane.xlu0 %21 }
  0x95   :  { %v25_v8 = vmul.f32 0.03125, %v22_v7  ;;  %v28_v9 = vmul.f32 %v26_v6, %v26_v6 }
  0x97   :  { %v27_v10 = vsub.f32 %v15_v1, %v25_v8  ;;  %v30_v11 = vsel %vm16_vm0, %v28_v9, 0.0 }
  0x98   :  { %31 = vadd.xlane.f32.xlu1 %v30_v11 }
  0x99   :  { %v29_v12 = vmul.f32 %v27_v10, %v27_v10 }
  0x9b   :  { %v33_v13 = vsel %vm16_vm0, %v29_v12, 0.0 }
  0x9c   :  { %34 = vadd.xlane.f32.xlu1 %v33_v13 }
 0x125   :  { %v32_v14 = vpop.xlane.xlu1 %31 }
 0x126   :  { %v36_v15 = vmul.f32 0.03125, %v32_v14 }
 0x128   :  { %v38_v16 = vadd.f32 1e-05, %v36_v15 }
 0x129   :  { %v35_v17 = vpop.xlane.xlu1 %34 }
 0x12a   :  { %70 = vrsqrt.f32 %v38_v16  ;;  %v37_v18 = vmul.f32 0.03125, %v35_v17 }
 0x12c   :  { %v39_v19 = vadd.f32 1e-05, %v37_v18 }
 0x12e   :  { %72 = vrsqrt.f32 %v39_v19 }
 0x134   :  { %v71_v20 = vpop.eup %70 }
 0x135   :  { %v42_v22 = vmul.f32 %v71_v20, %v26_v6 }
 0x137   :  { %v51_v24 = vmul.f32 %v68_v21, %v42_v22 }
 0x138   :  { %v73_v25 = vpop.eup %72 }
 0x139   :  { %v60_v26 = vadd.f32 %v69_v23, %v51_v24  ;;  %v43_v27 = vmul.f32 %v73_v25, %v27_v10 }
 0x13b   :  { %62 = vst.msk [vmem:[%s121_s3] sm:$0xff] %vm16_vm0, %v60_v26  ;;  %v52_v28 = vmul.f32 %v68_v21, %v43_v27 }
 0x13d   :  { %v61_v29 = vadd.f32 %v69_v23, %v52_v28 }
 0x13f   :  { %63 = vst.msk [vmem:[%s121_s3 + $0x8] sm:$0xff] %vm16_vm0, %v61_v29 }

// kernel: bert_model_forward.14
= control target key start
LH: loop header
LB: loop body
LE: loop exit
PB: predicated region body
PF: predicated region fallthrough
CT: control target
= control target key end

     0   :  { %vm28_vm0 = vcmask 261120   ;;  %v195_v0 = vmov 0.0   ;;  %vm196_vm1 = vmmov 0   ;;  %s276_s1 = inlined_call_operand.vmem [shape: bf16[32,32], index: 1, kind: input, shape index: {}]   ;;  %s277_s0 = inlined_call_operand.vmem [shape: f32[16,32], index: 0, kind: input, shape index: {}]   ;;  %s278_s3 = inlined_call_operand.vmem [shape: f32[16,32], index: 3, kind: input, shape index: {}]   ;;  %s279_s2 = inlined_call_operand.vmem [shape: f32[1,32], index: 2, kind: input, shape index: {}]   ;;  %s280_s4 = inlined_call_operand.vmem [shape: f32[1,32], index: 4, kind: input, shape index: {}]   ;;  %s281_s5 = inlined_call_operand.vmem [shape: f32[1,32], index: 5, kind: input, shape index: {}]   ;;  %s282_s6 = inlined_call_operand.vmem [shape: f32[16,32], index: 6, kind: output, shape index: {}]  }
   0x1   :  { %179 = vmatprep.subr.bf16.mxu0 %v195_v0  ;;  %v189_v1 = vld [vmem:[%s276_s1] sm:$0xff]   ;;  %183 = vmatprep.mubr.msk.bf16.mxu0 %vm196_vm1, %v195_v0  ;;  %29 = vst.msk [vmem:[#allocation2] sm:$0xff] %vm28_vm0, %v195_v0  ;;  %30 = vst.msk [vmem:[#allocation2 + $0x8] sm:$0xff] %vm28_vm0, %v195_v0  ;;  %v190_v2 = vld [vmem:[%s276_s1 + $0x8] sm:$0xff]  }
   0x2   :  { %180 = vmatpush3.bf16.msra.mxu0 %v189_v1  ;;  %v33_v3 = vld [vmem:[%s277_s0] sm:$0xff]  ;;  %v34_v4 = vld [vmem:[%s277_s0 + $0x8] sm:$0xff] }
   0x3   :  { %181 = vmatprep.subr.bf16.mxu0 %v195_v0  ;;  %v35_v5 = vpack.c.bf16 %v34_v4, %v33_v3  ;;  %v104_v14 = vld [vmem:[%s278_s3] sm:$0xff]  ;;  %v105_v17 = vld [vmem:[%s278_s3 + $0x8] sm:$0xff] }
   0x4   :  { %v173_v16 = vld [vmem:[%s279_s2] ss:$0 sm:$0xff] }
   0x5   :  { %v174_v42 = vld [vmem:[%s280_s4] ss:$0 sm:$0xff] }
   0x6   :  { %182 = vmatpush3.bf16.msra.mxu0 %v190_v2  ;;  %v175_v44 = vld [vmem:[%s281_s5] ss:$0 sm:$0xff] }
   0x8   :  { %v31_v6 = vld [vmem:[#allocation2] sm:$0xff]  ;;  %v32_v8 = vld [vmem:[#allocation2 + $0x8] sm:$0xff] }
   0x9   :  { %184 = vmatmul.mubr.msk.bf16.vlgmr.msra.gmra.mrb[0].mxu0 %vm28_vm0, %v35_v5 }
  0xdc   :  { %v90_v7 = vpop.f32.mrb[0].mxu0 }
  0xdd   :  { %v97_v9 = vadd.f32 %v90_v7, %v31_v6  ;;  %v185_v10 = vpop.f32.mrb[1].mxu0 }
  0xde   :  { %v93_v11 = vpop.f32.mrb[2].mxu0 }
  0xdf   :  { %99 = vst.msk [vmem:[#allocation2] sm:$0xff] %vm28_vm0, %v97_v9  ;;  %v98_v12 = vadd.f32 %v93_v11, %v32_v8  ;;  %v186_v13 = vpop.f32.mrb[3].mxu0 }
  0xe1   :  { %100 = vst.msk [vmem:[#allocation2 + $0x8] sm:$0xff] %vm28_vm0, %v98_v12 }
  0xe6   :  { %v106_v15 = vld [vmem:[#allocation2] sm:$0xff] }
  0xe7   :  { %v108_v18 = vadd.f32 %v106_v15, %v104_v14 }
  0xe8   :  { %v107_v19 = vld [vmem:[#allocation2 + $0x8] sm:$0xff] }
  0xe9   :  { %v117_v20 = vadd.f32 %v173_v16, %v108_v18  ;;  %v109_v21 = vadd.f32 %v107_v19, %v105_v17 }
  0xeb   :  { %v119_v22 = vsel %vm28_vm0, %v117_v20, 0.0  ;;  %v118_v23 = vadd.f32 %v173_v16, %v109_v21 }
  0xec   :  { %120 = vadd.xlane.f32.xlu0 %v119_v22 }
  0xed   :  { %v122_v24 = vsel %vm28_vm0, %v118_v23, 0.0 }
  0xf0   :  { %123 = vadd.xlane.f32.xlu0 %v122_v24 }
 0x179   :  { %v121_v25 = vpop.xlane.xlu0 %120 }
 0x17a   :  { %v126_v26 = vmul.f32 0.03125, %v121_v25 }
 0x17c   :  { %v128_v27 = vsub.f32 %v117_v20, %v126_v26 }
 0x17d   :  { %v124_v28 = vpop.xlane.xlu0 %123 }
 0x17e   :  { %v127_v29 = vmul.f32 0.03125, %v124_v28  ;;  %v130_v30 = vmul.f32 %v128_v27, %v128_v27 }
 0x180   :  { %v129_v31 = vsub.f32 %v118_v23, %v127_v29  ;;  %v132_v32 = vsel %vm28_vm0, %v130_v30, 0.0 }
 0x181   :  { %133 = vadd.xlane.f32.xlu1 %v132_v32 }
 0x182   :  { %v131_v33 = vmul.f32 %v129_v31, %v129_v31 }
 0x184   :  { %v135_v34 = vsel %vm28_vm0, %v131_v33, 0.0 }
 0x185   :  { %136 = vadd.xlane.f32.xlu1 %v135_v34 }
 0x20e   :  { %v134_v35 = vpop.xlane.xlu1 %133 }
 0x20f   :  { %v138_v36 = vmul.f32 0.03125, %v134_v35 }
 0x211   :  { %v140_v37 = vadd.f32 1e-05, %v138_v36 }
 0x212   :  { %v137_v38 = vpop.xlane.xlu1 %136 }
 0x213   :  { %191 = vrsqrt.f32 %v140_v37  ;;  %v139_v39 = vmul.f32 0.03125, %v137_v38 }
 0x215   :  { %v141_v40 = vadd.f32 1e-05, %v139_v39 }
 0x217   :  { %193 = vrsqrt.f32 %v141_v40 }
 0x21d   :  { %v192_v41 = vpop.eup %191 }
 0x21e   :  { %v144_v43 = vmul.f32 %v192_v41, %v128_v27 }
 0x220   :  { %v153_v45 = vmul.f32 %v174_v42, %v144_v43 }
 0x221   :  { %v194_v46 = vpop.eup %193 }
 0x222   :  { %v162_v47 = vadd.f32 %v175_v44, %v153_v45  ;;  %v145_v48 = vmul.f32 %v194_v46, %v129_v31 }
 0x224   :  { %164 = vst.msk [vmem:[%s282_s6] sm:$0xff] %vm28_vm0, %v162_v47  ;;  %v154_v49 = vmul.f32 %v174_v42, %v145_v48 }
 0x226   :  { %v163_v50 = vadd.f32 %v175_v44, %v154_v49 }
 0x228   :  { %165 = vst.msk [vmem:[%s282_s6 + $0x8] sm:$0xff] %vm28_vm0, %v163_v50 }

// kernel: bert_model_forward.13
= control target key start
LH: loop header
LB: loop body
LE: loop exit
PB: predicated region body
PF: predicated region fallthrough
CT: control target
= control target key end

     0   :  { %s492_s6 = smov 0   ;;  %s545_s0 = inlined_call_operand.vmem [shape: f32[2,8,96], index: 0, kind: input, shape index: {}]   ;;  %s546_s1 = inlined_call_operand.vmem [shape: f32[2,8,32], index: 1, kind: output, shape index: {}]  }
   0x1 LB: > { %s397_s7 = sadd.s32 4294967295, %s472_s6   ;;  %p401_p0 = scmp.ge.s32.totalorder %s472_s6, 1  ;;  %s472_s6 = sphi %s492_s6, %s11_s6  }
   0x2   : > { %p86_p1 = scmp.lt.s32.totalorder %s472_s6, 3 }
   0x4   : > { %p87_p2 = pnand %p401_p0, %p86_p1 }
   0x5   : > { %p104_p3 = scmp.lt.s32.totalorder (!%p87_p2), %s397_s7, 1  ;;  %v474_v0 = vmov (!%p87_p2), 0.0   ;;  %vm475_vm0 = vmmov (!%p87_p2), 0   ;;  %s476_s12 = smov (!%p87_p2), 96   ;;  %vm118_vm1 = vcmask (!%p87_p2), 130048   ;;  %vm165_vm2 = vcmask (!%p87_p2), 64512  }
   0x6   : > { %90 = sbr.rel (%p87_p2) target bundleno = 1534 (0x5fe), region = 24  ;;  %418 = vmatprep.subr.bf16.mxu0 (!%p87_p2), %v474_v0  ;;  %420 = vmatprep.mubr.msk.bf16.mxu0 (!%p87_p2), %vm475_vm0, %v474_v0  ;;  %s477_s13 = smov (!%p87_p2), 64   ;;  %vm183_vm3 = vcmask (!%p87_p2), 1043456   ;;  %vm342_vm4 = vcmask (!%p87_p2), 261248  }
   0x7   : > { %424 = vmatprep.subr.bf16.mxu1 (!%p87_p2), %v474_v0  ;;  %426 = vmatprep.mubr.msk.bf16.mxu1 (!%p87_p2), %vm475_vm0, %v474_v0  ;;  %s478_s14 = smov (!%p87_p2), 80   ;;  %s479_s15 = smov (!%p87_p2), 112  }
   0x8   : > { %s480_s19 = smov (!%p87_p2), 48   ;;  %s481_s20 = smov (!%p87_p2), 16  }
   0xd   : > { %s548_s7 = smov (!%p104_p3, %s397_s7), 1 }
   0xe   : > { %s402_s8 = sshll.u32 %s548_s7, 3 }
   0xf   : > { %s107_s11 = scalar_lea.vmem %s545_s0, %s402_s8  ;;  %s532_s18 = scalar_lea.vmem %s546_s1, %s402_s8 }
  0x10   : > { %v113_v1 = vld [vmem:[%s107_s11] sm:$0xff] }
  0x11   : > { %v510_v2 = vpack.c.bf16 %v113_v1, %v113_v1 }
  0x13   : > { %116 = vrot.lane.b32.xlu0 %v510_v2, %s476_s12  ;;  %178 = vrot.lane.b32.xlu1 %v510_v2, %s477_s13 }
  0x85   : > { %v117_v3 = vpop.permute.xlu0 %116  ;;  %v179_v10 = vpop.permute.xlu1 %178 }
  0x86   : > { %v123_v4 = vsel %vm118_vm1, %v117_v3, 0  ;;  %v185_v11 = vsel %vm183_vm3, %v179_v10, 0 }
  0x87   : > { %419 = vmatpush3.bf16.xpose.msra.mxu0 %v123_v4  ;;  %425 = vmatpush3.bf16.msra.mxu1 %v185_v11 }
  0x88   : > { %436 = vmatprep.subr.bf16.mxu0 %v474_v0  ;;  %430 = vmatprep.subr.bf16.mxu1 %v474_v0 }
  0x8e   : > { %421 = vmatmul.mubr.msk.bf16.vlgmr.msra.gmra.mrb[0].mxu0 %vm118_vm1, %v510_v2 }
  0x8f   : > { %438 = vmatprep.mubr.msk.bf16.mxu0 %vm475_vm0, %v474_v0 }
 0x161   : > { %v159_v5 = vpop.f32.mrb[0].mxu0 }
 0x162   : > { %v422_v6 = vpop.f32.mrb[1].mxu0  ;;  %v166_v7 = vsel %vm165_vm2, %v159_v5, -inf }
 0x163   : > { %167 = vmax.xlane.f32.xlu0 %v166_v7  ;;  %v162_v8 = vpop.f32.mrb[2].mxu0 }
 0x164   : > { %v423_v9 = vpop.f32.mrb[3].mxu0 }
 0x1f0   : > { %v168_v12 = vpop.xlane.xlu0 %167 }
 0x1f1   : > { %v169_v13 = vsub.f32 %v159_v5, %v168_v12 }
 0x1f3   : > { %v170_v14 = vmul.f32 1.442695, %v169_v13 }
 0x1f5   : > { %458 = vpow2.f32 %v170_v14 }
 0x1ff   : > { %v459_v15 = vpop.eup %458 }
 0x200   : > { %v172_v16 = vsel %vm165_vm2, %v459_v15, 0.0 }
 0x201   : > { %173 = vadd.xlane.f32.xlu1 %v172_v16 }
 0x212   : > { %230 = vrot.lane.b32.xlu1 %v510_v2, %s478_s14 }
 0x216   : > { %228 = vrot.lane.b32.xlu1 %v510_v2, %s479_s15 }
 0x28e   : > { %v174_v17 = vpop.xlane.xlu1 %173 }
 0x28f   : > { %460 = vrcp.f32 %v174_v17 }
 0x292   : > { %v231_v19 = vpop.permute.xlu1 %230 }
 0x293   : > { %v236_v21 = vsel %vm118_vm1, %v231_v19, 0 }
 0x296   : > { %v229_v23 = vpop.permute.xlu1 %228 }
 0x299   : > { %v461_v18 = vpop.eup %460 }
 0x29a   : > { %v176_v20 = vmul.f32 %v461_v18, %v459_v15 }
 0x29c   : > { %v177_v22 = vpack.c.bf16 %v176_v20, %v176_v20 }
 0x29e   : > { %427 = vmatmul.mubr.msk.bf16.vlgmr.msra.gmra.mrb[0].mxu1 %vm165_vm2, %v177_v22 }
 0x29f   : > { %431 = vmatpush3.bf16.xpose.msra.mxu1 %v236_v21  ;;  %432 = vmatprep.mubr.msk.bf16.mxu1 %vm475_vm0, %v474_v0 }
 0x2a6   : > { %433 = vmatmul.mubr.msk.bf16.vlgmr.msra.gmra.mrb[4].mxu1 %vm118_vm1, %v229_v23 }
 0x371   : > { %v221_v24 = vpop.f32.mrb[0].mxu1 }
 0x372   : > { %227 = vst.msk [vmem:[%s532_s18] sm:$0xff] %vm118_vm1, %v221_v24  ;;  %v428_v25 = vpop.f32.mrb[1].mxu1 }
 0x373   : > { %v224_v26 = vpop.f32.mrb[2].mxu1 }
 0x374   : > { %v429_v27 = vpop.f32.mrb[3].mxu1 }
 0x379   : > { %v272_v28 = vpop.f32.mrb[4].mxu1 }
 0x37a   : > { %v434_v29 = vpop.f32.mrb[5].mxu1  ;;  %v278_v30 = vsel %vm165_vm2, %v272_v28, -inf }
 0x37b   : > { %279 = vmax.xlane.f32.xlu1 %v278_v30  ;;  %v275_v31 = vpop.f32.mrb[6].mxu1 }
 0x37c   : > { %v435_v32 = vpop.f32.mrb[7].mxu1 }
 0x408   : > { %v280_v33 = vpop.xlane.xlu1 %279 }
 0x409   : > { %v281_v34 = vsub.f32 %v272_v28, %v280_v33 }
 0x40b   : > { %v282_v35 = vmul.f32 1.442695, %v281_v34 }
 0x40d   : > { %462 = vpow2.f32 %v282_v35 }
 0x417   : > { %v463_v36 = vpop.eup %462 }
 0x418   : > { %v284_v37 = vsel %vm165_vm2, %v463_v36, 0.0 }
 0x419   : > { %285 = vadd.xlane.f32.xlu0 %v284_v37 }
 0x42f   : > { %290 = vrot.lane.b32.xlu0 %v510_v2, %s480_s19 }
 0x4a6   : > { %v286_v38 = vpop.xlane.xlu0 %285 }
 0x4a7   : > { %464 = vrcp.f32 %v286_v38 }
 0x4aa   : > { %v291_v39 = vpop.permute.xlu0 %290 }
 0x4ab   : > { %v296_v40 = vsel %vm183_vm3, %v291_v39, 0 }
 0x4ac   : > { %437 = vmatpush3.bf16.msra.mxu0 %v296_v40 }
 0x4b1   : > { %v465_v41 = vpop.eup %464 }
 0x4b2   : > { %v288_v42 = vmul.f32 %v465_v41, %v463_v36 }
 0x4b4   : > { %v289_v43 = vpack.c.bf16 %v288_v42, %v288_v42 }
 0x4b6   : > { %439 = vmatmul.mubr.msk.bf16.vlgmr.msra.gmra.mrb[4].mxu0 %vm165_vm2, %v289_v43 }
 0x589   : > { %v332_v44 = vpop.f32.mrb[4].mxu0 }
 0x58a   : > { %339 = vrot.lane.b32.xlu0 %v332_v44, %s481_s20  ;;  %v440_v45 = vpop.f32.mrb[5].mxu0 }
 0x58b   : > { %v335_v46 = vpop.f32.mrb[6].mxu0 }
 0x58c   : > { %v441_v47 = vpop.f32.mrb[7].mxu0 }
 0x5fc   : > { %v340_v48 = vpop.permute.xlu0 %339 }
 0x5fd   : > { %343 = vst.msk [vmem:[%s532_s18] sm:$0xff] %vm342_vm4, %v340_v48 }
 0x5fe PF: > { %s11_s6 = sadd.s32 1, %s472_s6  }
 0x5ff   : > { %p8_p4 = scmp.ge.s32.totalorder %s11_s6, 4  }
 0x601   :  { %10 = sbr.rel (!%p8_p4) target bundleno = 1 (0x1), region = 54 }

// kernel: bert_model_forward.15
= control target key start
LH: loop header
LB: loop body
LE: loop exit
PB: predicated region body
PF: predicated region fallthrough
CT: control target
= control target key end

     0   :  { %vm19_vm0 = vcmask 523264   ;;  %v146_v0 = vmov 0.0   ;;  %vm147_vm1 = vmmov 0   ;;  %vm43_vm2 = vcmask 261120   ;;  %s195_s1 = inlined_call_operand.vmem [shape: bf16[32,64], index: 1, kind: input, shape index: {}]   ;;  %s196_s0 = inlined_call_operand.vmem [shape: f32[16,32], index: 0, kind: input, shape index: {}]   ;;  %s197_s2 = inlined_call_operand.vmem [shape: f32[1,64], index: 2, kind: input, shape index: {}]   ;;  %s198_s3 = inlined_call_operand.vmem [shape: f32[16,64], index: 3, kind: output, shape index: {}]  }
   0x1   :  { %130 = vmatprep.subr.bf16.mxu0 %v146_v0  ;;  %v140_v1 = vld [vmem:[%s195_s1] sm:$0xff]   ;;  %134 = vmatprep.mubr.msk.bf16.mxu0 %vm147_vm1, %v146_v0  ;;  %20 = vst.msk [vmem:[#allocation2] sm:$0xff] %vm19_vm0, %v146_v0  ;;  %21 = vst.msk [vmem:[#allocation2 + $0x8] sm:$0xff] %vm19_vm0, %v146_v0  ;;  %v141_v2 = vld [vmem:[%s195_s1 + $0x8] sm:$0xff]  }
   0x2   :  { %131 = vmatpush3.bf16.msra.mxu0 %v140_v1  ;;  %v24_v3 = vld [vmem:[%s196_s0] sm:$0xff]  ;;  %v25_v4 = vld [vmem:[%s196_s0 + $0x8] sm:$0xff] }
   0x3   :  { %132 = vmatprep.subr.bf16.mxu0 %v146_v0  ;;  %v26_v5 = vpack.c.bf16 %v25_v4, %v24_v3  ;;  %v126_v14 = vld [vmem:[%s197_s2] ss:$0 sm:$0xff] }
   0x6   :  { %133 = vmatpush3.bf16.msra.mxu0 %v141_v2 }
   0x8   :  { %v22_v6 = vld [vmem:[#allocation2] sm:$0xff]  ;;  %v23_v8 = vld [vmem:[#allocation2 + $0x8] sm:$0xff] }
   0x9   :  { %135 = vmatmul.mubr.msk.bf16.vlgmr.msra.gmra.mrb[0].mxu0 %vm43_vm2, %v26_v5 }
  0xdc   :  { %v81_v7 = vpop.f32.mrb[0].mxu0 }
  0xdd   :  { %v88_v9 = vadd.f32 %v81_v7, %v22_v6  ;;  %v136_v10 = vpop.f32.mrb[1].mxu0 }
  0xde   :  { %v84_v11 = vpop.f32.mrb[2].mxu0 }
  0xdf   :  { %91 = vst.msk [vmem:[#allocation2] sm:$0xff] %vm19_vm0, %v88_v9  ;;  %v89_v12 = vadd.f32 %v84_v11, %v23_v8  ;;  %v137_v13 = vpop.f32.mrb[3].mxu0 }
  0xe1   :  { %92 = vst.msk [vmem:[#allocation2 + $0x8] sm:$0xff] %vm19_vm0, %v89_v12 }
  0xe6   :  { %v96_v15 = vld [vmem:[#allocation2] sm:$0xff] }
  0xe7   :  { %v105_v16 = vadd.f32 %v126_v14, %v96_v15 }
  0xe8   :  { %v97_v17 = vld [vmem:[#allocation2 + $0x8] sm:$0xff] }
  0xe9   :  { %v109_v18 = vmul.f32 0.70710677, %v105_v16  ;;  %v106_v19 = vadd.f32 %v126_v14, %v97_v17  ;;  %v107_v22 = vmul.f32 0.5, %v105_v16 }
  0xeb   :  { %142 = verf.f32 %v109_v18  ;;  %v110_v20 = vmul.f32 0.70710677, %v106_v19  ;;  %v108_v26 = vmul.f32 0.5, %v106_v19 }
  0xed   :  { %144 = verf.f32 %v110_v20 }
  0xf5   :  { %v143_v21 = vpop.eup %142 }
  0xf6   :  { %v113_v23 = vadd.f32 1.0, %v143_v21 }
  0xf7   :  { %v145_v24 = vpop.eup %144 }
  0xf8   :  { %v115_v25 = vmul.f32 %v113_v23, %v107_v22  ;;  %v114_v27 = vadd.f32 1.0, %v145_v24 }
  0xfa   :  { %117 = vst.msk [vmem:[%s198_s3] sm:$0xff] %vm19_vm0, %v115_v25  ;;  %v116_v28 = vmul.f32 %v114_v27, %v108_v26 }
  0xfc   :  { %118 = vst.msk [vmem:[%s198_s3 + $0x8] sm:$0xff] %vm19_vm0, %v116_v28 }

// kernel: bert_model_forward.16
= control target key start
LH: loop header
LB: loop body
LE: loop exit
PB: predicated region body
PF: predicated region fallthrough
CT: control target
= control target key end

     0   :  { %vm28_vm0 = vcmask 261120   ;;  %v222_v0 = vmov 0.0   ;;  %vm223_vm1 = vmmov 0   ;;  %vm68_vm2 = vcmask 523264   ;;  %s308_s1 = inlined_call_operand.vmem [shape: bf16[64,32], index: 1, kind: input, shape index: {}]   ;;  %s309_s0 = inlined_call_operand.vmem [shape: f32[16,64], index: 0, kind: input, shape index: {}]   ;;  %s310_s3 = inlined_call_operand.vmem [shape: f32[16,32], index: 3, kind: input, shape index: {}]   ;;  %s311_s2 = inlined_call_operand.vmem [shape: f32[1,32], index: 2, kind: input, shape index: {}]   ;;  %s312_s4 = inlined_call_operand.vmem [shape: f32[1,32], index: 4, kind: input, shape index: {}]   ;;  %s313_s5 = inlined_call_operand.vmem [shape: f32[1,32], index: 5, kind: input, shape index: {}]   ;;  %s314_s6 = inlined_call_operand.vmem [shape: f32[16,32], index: 6, kind: output, shape index: {}]  }
   0x1   :  { %200 = vmatprep.subr.bf16.mxu0 %v222_v0  ;;  %v214_v1 = vld [vmem:[%s308_s1] sm:$0xff]   ;;  %208 = vmatprep.mubr.msk.bf16.mxu0 %vm223_vm1, %v222_v0  ;;  %29 = vst.msk [vmem:[#allocation2] sm:$0xff] %vm28_vm0, %v222_v0  ;;  %30 = vst.msk [vmem:[#allocation2 + $0x8] sm:$0xff] %vm28_vm0, %v222_v0  ;;  %v215_v2 = vld [vmem:[%s308_s1 + $0x8] sm:$0xff]  }
   0x2   :  { %201 = vmatpush3.bf16.msra.mxu0 %v214_v1  ;;  %v216_v3 = vld [vmem:[%s308_s1 + $0x10] sm:$0xff]   ;;  %v217_v4 = vld [vmem:[%s308_s1 + $0x18] sm:$0xff]   ;;  %v33_v5 = vld [vmem:[%s309_s0] sm:$0xff] }
   0x3   :  { %202 = vmatprep.subr.bf16.mxu0 %v222_v0  ;;  %v34_v6 = vld [vmem:[%s309_s0 + $0x8] sm:$0xff]  ;;  %v121_v16 = vld [vmem:[%s310_s3] sm:$0xff] }
   0x4   :  { %v35_v7 = vpack.c.bf16 %v34_v6, %v33_v5  ;;  %v192_v18 = vld [vmem:[%s311_s2] ss:$0 sm:$0xff]  ;;  %v122_v19 = vld [vmem:[%s310_s3 + $0x8] sm:$0xff] }
   0x5   :  { %v193_v44 = vld [vmem:[%s312_s4] ss:$0 sm:$0xff] }
   0x6   :  { %203 = vmatpush3.bf16.msra.mxu0 %v215_v2  ;;  %v194_v46 = vld [vmem:[%s313_s5] ss:$0 sm:$0xff] }
   0x7   :  { %204 = vmatprep.subr.bf16.mxu0 %v222_v0 }
   0x8   :  { %v31_v8 = vld [vmem:[#allocation2] sm:$0xff]  ;;  %v32_v10 = vld [vmem:[#allocation2 + $0x8] sm:$0xff] }
   0xa   :  { %205 = vmatpush3.bf16.msra.mxu0 %v216_v3 }
   0xb   :  { %206 = vmatprep.subr.bf16.mxu0 %v222_v0 }
   0xe   :  { %207 = vmatpush3.bf16.msra.mxu0 %v217_v4 }
  0x11   :  { %209 = vmatmul.mubr.msk.bf16.vlgmr.msra.gmra.mrb[0].mxu0 %vm68_vm2, %v35_v7 }
  0xe4   :  { %v106_v9 = vpop.f32.mrb[0].mxu0 }
  0xe5   :  { %v113_v11 = vadd.f32 %v106_v9, %v31_v8  ;;  %v210_v12 = vpop.f32.mrb[1].mxu0 }
  0xe6   :  { %v109_v13 = vpop.f32.mrb[2].mxu0 }
  0xe7   :  { %116 = vst.msk [vmem:[#allocation2] sm:$0xff] %vm28_vm0, %v113_v11  ;;  %v114_v14 = vadd.f32 %v109_v13, %v32_v10  ;;  %v211_v15 = vpop.f32.mrb[3].mxu0 }
  0xe9   :  { %117 = vst.msk [vmem:[#allocation2 + $0x8] sm:$0xff] %vm28_vm0, %v114_v14 }
  0xee   :  { %v123_v17 = vld [vmem:[#allocation2] sm:$0xff] }
  0xef   :  { %v125_v20 = vadd.f32 %v123_v17, %v121_v16 }
  0xf0   :  { %v124_v21 = vld [vmem:[#allocation2 + $0x8] sm:$0xff] }
  0xf1   :  { %v134_v22 = vadd.f32 %v192_v18, %v125_v20  ;;  %v126_v23 = vadd.f32 %v124_v21, %v122_v19 }
  0xf3   :  { %v136_v24 = vsel %vm28_vm0, %v134_v22, 0.0  ;;  %v135_v25 = vadd.f32 %v192_v18, %v126_v23 }
  0xf4   :  { %137 = vadd.xlane.f32.xlu0 %v136_v24 }
  0xf5   :  { %v139_v26 = vsel %vm28_vm0, %v135_v25, 0.0 }
  0xf8   :  { %140 = vadd.xlane.f32.xlu0 %v139_v26 }
 0x181   :  { %v138_v27 = vpop.xlane.xlu0 %137 }
 0x182   :  { %v143_v28 = vmul.f32 0.03125, %v138_v27 }
 0x184   :  { %v145_v29 = vsub.f32 %v134_v22, %v143_v28 }
 0x185   :  { %v141_v30 = vpop.xlane.xlu0 %140 }
 0x186   :  { %v144_v31 = vmul.f32 0.03125, %v141_v30  ;;  %v147_v32 = vmul.f32 %v145_v29, %v145_v29 }
 0x188   :  { %v146_v33 = vsub.f32 %v135_v25, %v144_v31  ;;  %v149_v34 = vsel %vm28_vm0, %v147_v32, 0.0 }
 0x189   :  { %150 = vadd.xlane.f32.xlu1 %v149_v34 }
 0x18a   :  { %v148_v35 = vmul.f32 %v146_v33, %v146_v33 }
 0x18c   :  { %v152_v36 = vsel %vm28_vm0, %v148_v35, 0.0 }
 0x18d   :  { %153 = vadd.xlane.f32.xlu1 %v152_v36 }
 0x216   :  { %v151_v37 = vpop.xlane.xlu1 %150 }
 0x217   :  { %v155_v38 = vmul.f32 0.03125, %v151_v37 }
 0x219   :  { %v157_v39 = vadd.f32 1e-05, %v155_v38 }
 0x21a   :  { %v154_v40 = vpop.xlane.xlu1 %153 }
 0x21b   :  { %218 = vrsqrt.f32 %v157_v39  ;;  %v156_v41 = vmul.f32 0.03125, %v154_v40 }
 0x21d   :  { %v158_v42 = vadd.f32 1e-05, %v156_v41 }
 0x21f   :  { %220 = vrsqrt.f32 %v158_v42 }
 0x225   :  { %v219_v43 = vpop.eup %218 }
 0x226   :  { %v161_v45 = vmul.f32 %v219_v43, %v145_v29 }
 0x228   :  { %v170_v47 = vmul.f32 %v193_v44, %v161_v45 }
 0x229   :  { %v221_v48 = vpop.eup %220 }
 0x22a   :  { %v179_v49 = vadd.f32 %v194_v46, %v170_v47  ;;  %v162_v50 = vmul.f32 %v221_v48, %v146_v33 }
 0x22c   :  { %181 = vst.msk [vmem:[%s314_s6] sm:$0xff] %vm28_vm0, %v179_v49  ;;  %v171_v51 = vmul.f32 %v193_v44, %v162_v50 }
 0x22e   :  { %v180_v52 = vadd.f32 %v194_v46, %v171_v51 }
 0x230   :  { %182 = vst.msk [vmem:[%s314_s6 + $0x8] sm:$0xff] %vm28_vm0, %v180_v52 }

</bundles_post_ra>
